<compile_context>
chip_gen: v5e
topology: v5e:2x2
jax: 0.10.0
libtpu: 0.0.40
codegen_flags: <defaults>
</compile_context>

<pallas_src>
import functools

import jax
import jax.numpy as jnp
from jax import lax
from jax.experimental import pallas as pl
from jax.experimental.pallas import tpu as pltpu

KERNEL_SIZE = 4
STRIDE = 2
PADDING = 1
BN_EPS = 1e-5
LANE = 128
SUBLANE = 8
MATMUL_DTYPE = jnp.float32  # bfloat16 on v6e/v7x for more MXU throughput (re-check tolerance)


def _round_up(x, m):
    return (x + m - 1) // m * m


def _vmem_limit_bytes():
    """Generation-aware VMEM budget: ~3/4 of physical, capped at 96 MiB."""
    try:
        cap = pltpu.get_tpu_info().vmem_capacity_bytes
    except Exception:  # older jax / interpret mode: assume 128 MiB parts
        cap = 128 * 1024 * 1024
    return int(min(cap * 3 // 4, 96 * 1024 * 1024))


# -----------------------------------------------------------------------------
# Small-Co fast path: all 4 output phases packed into the lane axis, grid=(N,)
# -----------------------------------------------------------------------------
def _conv_packed_kernel(H, W, x_ref, w_ref, y_ref, stats_ref):
    # x_ref:     [1, Hq, Wq, Kp]  tap-folded im2col (Wq % 8 == 0, Kp % 128 == 0)
    # w_ref:     [Kp, 128]        phases packed on lanes: col = (2*ph+pw)*Co + co
    # y_ref:     [1, Hq*Wq, 128]  packed conv output (lane-dense stores)
    # stats_ref: [1, 8, 128]      rows 0..3 = per-phase window sums, rows 4..7 = sum-sq
    _, Hq, Wq, Kp = x_ref.shape
    y = jnp.dot(x_ref[0].reshape(Hq * Wq, Kp), w_ref[...],
                preferred_element_type=jnp.float32)            # [Hq*Wq, 128]
    y_ref[...] = y.reshape(y_ref.shape).astype(y_ref.dtype)

    # Per-phase BN partial stats over each phase's valid HxW window
    # (spatially padded rows/cols of xcol never enter these windows).
    y3 = y.reshape(Hq, Wq, y.shape[-1])
    for p, (ph, pw) in enumerate(((0, 0), (0, 1), (1, 0), (1, 1))):
        win = y3[ph:ph + H, pw:pw + W, :]
        stats_ref[0, p:p + 1, :] = jnp.sum(win, axis=(0, 1)).reshape(1, -1)
        stats_ref[0, p + 4:p + 5, :] = jnp.sum(win * win, axis=(0, 1)).reshape(1, -1)


# -----------------------------------------------------------------------------
# General path (4*Co > 128): one phase per grid step, lane-dense Co, grid=(N, 4)
# -----------------------------------------------------------------------------
def _conv_phase_kernel(H, W, Wv, x_ref, w_ref, y_ref, stats_ref):
    # x_ref:     [1, H+1, Wv+1, Kp]    tap-folded im2col (reused across the 4 phase steps)
    # w_ref:     [4, Kp, Co_pad]       all phase weights, fetched once (constant index_map)
    # y_ref:     [1, 1, H, Wv, Co_pad] conv output for this (image, phase)
    # stats_ref: [1, 8, Co_pad]        row 0 = sum, row 1 = sum-sq (revisited over p)
    p = pl.program_id(1)
    Kp = x_ref.shape[3]
    Co_pad = y_ref.shape[4]

    @pl.when(p == 0)
    def _():
        # NOTE: relies on the phase axis being the innermost ('arbitrary') grid axis.
        stats_ref[...] = jnp.zeros_like(stats_ref)

    def do_phase(idx, ph, pw):
        @pl.when(p == idx)
        def _():
            xs = x_ref[0, ph:ph + H, pw:pw + Wv, :]            # [H, Wv, Kp]
            y = jnp.dot(xs.reshape(H * Wv, Kp), w_ref[idx],
                        preferred_element_type=jnp.float32)    # [H*Wv, Co_pad]
            y_ref[...] = y.reshape(y_ref.shape).astype(y_ref.dtype)
            win = y.reshape(H, Wv, Co_pad)[:, :W, :]           # drop spatially padded cols
            stats_ref[0, 0:1, :] += jnp.sum(win, axis=(0, 1)).reshape(1, Co_pad)
            stats_ref[0, 1:2, :] += jnp.sum(win * win, axis=(0, 1)).reshape(1, Co_pad)

    do_phase(0, 0, 0)
    do_phase(1, 0, 1)
    do_phase(2, 1, 0)
    do_phase(3, 1, 1)


# -----------------------------------------------------------------------------
# Wrapper
# -----------------------------------------------------------------------------
def _im2col(x_nchw):
    """NCHW -> tap-folded NHWC im2col: xcol[n,u,v,(2dh+dw)*Ci+ci] = x_pad[n,u+dh,v+dw,ci]."""
    N, Ci, H, W = x_nchw.shape
    x = jnp.transpose(x_nchw, (0, 2, 3, 1)).astype(jnp.float32)
    x_pad = jnp.pad(x, ((0, 0), (1, 1), (1, 1), (0, 0)))
    parts = [x_pad[:, dh:dh + H + 1, dw:dw + W + 1, :] for dh in (0, 1) for dw in (0, 1)]
    return jnp.concatenate(parts, axis=-1)                     # [N, H+1, W+1, 4*Ci]
    # TODO(synk): for very deep Ci build this 4-tap folding in-kernel from x_pad to avoid
    # quadrupling the input HBM traffic (the copies ride free vld/XLU slots under the MXU).


def _fold_weights(w_t):
    """Per-phase folded ConvTranspose weights, phase order p = 2*ph + pw, each [4*Ci, Co].
    Output (2a+ph, 2b+pw): y = sum_{dh,dw,ci} x_pad[a+ph+dh,b+pw+dw,ci]*w_t[ci,co,3-ph-2dh,3-pw-2dw]."""
    w_t = w_t.astype(jnp.float32)
    out = []
    for ph in (0, 1):
        for pw in (0, 1):
            taps = [w_t[:, :, 3 - ph - 2 * dh, 3 - pw - 2 * dw]     # each [Ci, Co]
                    for dh in (0, 1) for dw in (0, 1)]
            out.append(jnp.concatenate(taps, axis=0))               # [4*Ci, Co]
    return out


def _upblock_forward(x_nchw, w_t, gamma, beta):
    N, Ci, H, W = x_nchw.shape
    Co = w_t.shape[1]
    Kc = 4 * Ci
    Kp = _round_up(Kc, LANE)              # lane-dense contraction dim (full MXU K fill)
    Ho, Wo = STRIDE * H, STRIDE * W
    vmem_cap = _vmem_limit_bytes()
    cnt = jnp.float32(N * Ho * Wo)
    gamma = gamma.astype(jnp.float32)
    beta = beta.astype(jnp.float32)

    xcol = _im2col(x_nchw)                # [N, H+1, W+1, Kc]
    w_phase = _fold_weights(w_t)          # 4 x [Kc, Co]

    if 4 * Co <= LANE:
        # ------------------------- packed-phase fast path -------------------------
        Hq = H + 1
        Wq = _round_up(W + 1, SUBLANE)
        R = Hq * Wq
        xp = jnp.pad(xcol, ((0, 0), (0, 0), (0, Wq - (W + 1)), (0, Kp - Kc))).astype(MATMUL_DTYPE)
        wp = jnp.pad(jnp.concatenate(w_phase, axis=1),
                     ((0, Kp - Kc), (0, LANE - 4 * Co))).astype(MATMUL_DTYPE)

        y_pk, stats = pl.pallas_call(
            functools.partial(_conv_packed_kernel, H, W),
            grid=(N,),
            in_specs=[
                pl.BlockSpec((1, Hq, Wq, Kp), lambda n: (n, 0, 0, 0)),
                pl.BlockSpec((Kp, LANE), lambda n: (0, 0)),          # resident for whole grid
            ],
            out_specs=[
                pl.BlockSpec((1, R, LANE), lambda n: (n, 0, 0)),
                pl.BlockSpec((1, 8, LANE), lambda n: (n, 0, 0)),
            ],
            out_shape=[
                jax.ShapeDtypeStruct((N, R, LANE), jnp.float32),
                jax.ShapeDtypeStruct((N, 8, LANE), jnp.float32),
            ],
            compiler_params=pltpu.CompilerParams(
                dimension_semantics=("parallel",),
                vmem_limit_bytes=vmem_cap),
            cost_estimate=pl.CostEstimate(
                flops=2 * N * R * Kp * LANE, transcendentals=0,
                bytes_accessed=(xp.size * xp.dtype.itemsize + wp.size * wp.dtype.itemsize
                                + N * R * LANE * 4 + N * 8 * LANE * 4)),
        )(xp, wp)

        # O(Co) BN epilogue: training-mode batch stats -> per-channel scale/bias.
        tot = jnp.sum(stats, axis=0)                                  # [8, 128]
        s = sum(tot[p, p * Co:(p + 1) * Co] for p in range(4))        # [Co]
        sq = sum(tot[p + 4, p * Co:(p + 1) * Co] for p in range(4))
        mean = s / cnt
        var = jnp.maximum(sq / cnt - mean * mean, 0.0)                # biased variance
        scale = gamma * lax.rsqrt(var + BN_EPS)
        bias = beta - mean * scale

        # Phase de-interleave + fused normalize: single XLA pass (no second Pallas call).
        y3 = y_pk.reshape(N, Hq, Wq, LANE)
        phases = [y3[:, ph:ph + H, pw:pw + W, (2 * ph + pw) * Co:(2 * ph + pw + 1) * Co]
                  for ph in (0, 1) for pw in (0, 1)]
        y4 = jnp.stack(phases, axis=1) * scale + bias                 # [N, 4, H, W, Co]
    else:
        # ----------------------------- per-phase path -----------------------------
        Co_pad = _round_up(Co, LANE)
        Wv = _round_up(W, SUBLANE)
        xp = jnp.pad(xcol, ((0, 0), (0, 0), (0, Wv - W), (0, Kp - Kc))).astype(MATMUL_DTYPE)
        wf = jnp.stack([jnp.pad(w, ((0, Kp - Kc), (0, Co_pad - Co))) for w in w_phase],
                       axis=0).astype(MATMUL_DTYPE)                   # [4, Kp, Co_pad]

        y4r, stats = pl.pallas_call(
            functools.partial(_conv_phase_kernel, H, W, Wv),
            grid=(N, 4),
            in_specs=[
                pl.BlockSpec((1, H + 1, Wv + 1, Kp), lambda n, p: (n, 0, 0, 0)),
                pl.BlockSpec((4, Kp, Co_pad), lambda n, p: (0, 0, 0)),  # fetched once
            ],
            out_specs=[
                pl.BlockSpec((1, 1, H, Wv, Co_pad), lambda n, p: (n, p, 0, 0, 0)),
                pl.BlockSpec((1, 8, Co_pad), lambda n, p: (n, 0, 0)),
            ],
            out_shape=[
                jax.ShapeDtypeStruct((N, 4, H, Wv, Co_pad), jnp.float32),
                jax.ShapeDtypeStruct((N, 8, Co_pad), jnp.float32),
            ],
            compiler_params=pltpu.CompilerParams(
                dimension_semantics=("parallel", "arbitrary"),
                vmem_limit_bytes=vmem_cap),
            cost_estimate=pl.CostEstimate(
                flops=2 * N * 4 * H * Wv * Kp * Co_pad, transcendentals=0,
                bytes_accessed=(xp.size * xp.dtype.itemsize + wf.size * wf.dtype.itemsize
                                + N * 4 * H * Wv * Co_pad * 4 + N * 8 * Co_pad * 4)),
        )(xp, wf)
        # TODO(synk): for large H,W on v7x (64 MiB VMEM) add a row-stripe grid axis; whole-image
        # blocks are KB-scale here.  pipeline_mode=pl.Buffered(3) on the y out_spec is a further
        # knob for K-thin, writeback-bound shapes.

        tot = jnp.sum(stats, axis=0)                                  # [8, Co_pad]
        mean = tot[0, :Co] / cnt
        var = jnp.maximum(tot[1, :Co] / cnt - mean * mean, 0.0)
        scale = gamma * lax.rsqrt(var + BN_EPS)
        bias = beta - mean * scale
        y4 = y4r[:, :, :, :W, :Co] * scale + bias                     # [N, 4, H, W, Co]

    # LeakyReLU(True) -> negative_slope == 1.0 -> identity (intentionally omitted).
    y4 = y4.reshape(N, 2, 2, H, W, Co)
    y = jnp.transpose(y4, (0, 5, 3, 1, 4, 2)).reshape(N, Co, Ho, Wo)
    return y


upblock_forward = jax.jit(_upblock_forward)


def upblock_reference(x_nchw, w_t, gamma, beta):
    """Pure-JAX reference (f32) for the numerical self-check."""
    x = jnp.transpose(x_nchw, (0, 2, 3, 1)).astype(jnp.float32)
    w_hwio = jnp.transpose(jnp.flip(w_t, axis=(2, 3)), (2, 3, 0, 1)).astype(jnp.float32)
    ppad = KERNEL_SIZE - 1 - PADDING
    y = lax.conv_general_dilated(
        x, w_hwio, window_strides=(1, 1),
        padding=[(ppad, ppad), (ppad, ppad)],
        lhs_dilation=(STRIDE, STRIDE),
        dimension_numbers=("NHWC", "HWIO", "NHWC"))
    mean = jnp.mean(y, axis=(0, 1, 2), keepdims=True)
    var = jnp.mean((y - mean) ** 2, axis=(0, 1, 2), keepdims=True)
    y = (y - mean) * lax.rsqrt(var + BN_EPS) * gamma.reshape(1, 1, 1, -1) + beta.reshape(1, 1, 1, -1)
    # LeakyReLU(negative_slope=1.0) == identity
    return jnp.transpose(y, (0, 3, 1, 2))


if __name__ == "__main__":
    def check(key, N, Ci, Co, H, W):
        kx, kw, kg, kb = jax.random.split(key, 4)
        x = jax.random.normal(kx, (N, Ci, H, W), dtype=jnp.float32)                # NCHW input
        w_t = 0.1 * jax.random.normal(kw, (Ci, Co, KERNEL_SIZE, KERNEL_SIZE),      # [Ci,Co,KH,KW]
                                      dtype=jnp.float32)
        gamma = 1.0 + 0.1 * jax.random.normal(kg, (Co,), dtype=jnp.float32)        # BN weight
        beta = 0.1 * jax.random.normal(kb, (Co,), dtype=jnp.float32)               # BN bias
        out = jax.block_until_ready(upblock_forward(x, w_t, gamma, beta))
        ref = jax.block_until_ready(upblock_reference(x, w_t, gamma, beta))
        assert out.shape == (N, Co, STRIDE * H, STRIDE * W), out.shape
        max_err = float(jnp.max(jnp.abs(out - ref)))
        assert jnp.allclose(out, ref, rtol=1e-3, atol=1e-3), max_err

    k1, k2 = jax.random.split(jax.random.PRNGKey(0))
    check(k1, N=2, Ci=4, Co=8, H=16, W=16)     # packed-phase fast path (4*Co <= 128)
    check(k2, N=2, Ci=8, Co=40, H=12, W=12)    # per-phase path (4*Co > 128), W % 8 != 0
    print("KERNEL_OK")
</pallas_src>

<mosaic_0001>
module attributes {stable_mosaic.version = 11 : i64} {
  func.func @_conv_packed_kernel(%arg0: i32, %arg1: memref<1x17x24x128xf32, #tpu.memory_space<vmem>>, %arg2: memref<128x128xf32, #tpu.memory_space<vmem>>, %arg3: memref<1x408x128xf32, #tpu.memory_space<vmem>>, %arg4: memref<1x8x128xf32, #tpu.memory_space<vmem>>) attributes {dimension_semantics = [#tpu.dimension_semantics<parallel>], iteration_bounds = array<i64: 2>, scalar_prefetch = 0 : i64, scratch_operands = 0 : i64, tpu.core_type = #tpu.core_type<tc>, window_params = [{transform_indices = @transform_0, window_bounds = array<i64: 1, 17, 24, 128>}, {pipeline_mode = #tpu.pipeline_mode<synchronous>, transform_indices = @transform_1, window_bounds = array<i64: 128, 128>}, {transform_indices = @transform_2, window_bounds = array<i64: 1, 408, 128>}, {transform_indices = @transform_3, window_bounds = array<i64: 1, 8, 128>}]} {
    %c0 = arith.constant 0 : index
    %c0_0 = arith.constant 0 : index
    %c0_1 = arith.constant 0 : index
    %c0_2 = arith.constant 0 : index
    %0 = vector.load %arg1[%c0, %c0_0, %c0_1, %c0_2] : memref<1x17x24x128xf32, #tpu.memory_space<vmem>>, vector<1x17x24x128xf32>
    %1 = vector.shape_cast %0 : vector<1x17x24x128xf32> to vector<17x24x128xf32>
    %2 = vector.shape_cast %1 : vector<17x24x128xf32> to vector<408x128xf32>
    %c0_3 = arith.constant 0 : index
    %c0_4 = arith.constant 0 : index
    %3 = vector.load %arg2[%c0_3, %c0_4] : memref<128x128xf32, #tpu.memory_space<vmem>>, vector<128x128xf32>
    %cst = arith.constant dense<0.000000e+00> : vector<408x128xf32>
    %4 = tpu.matmul %2, %3, %cst {dimension_numbers = #tpu.dot_dimension_numbers<[1], [0], [0], [1], [0, 0, 1, 1], [], []>} : vector<408x128xf32>, vector<128x128xf32>, vector<408x128xf32> -> vector<408x128xf32>
    %5 = vector.shape_cast %4 : vector<408x128xf32> to vector<1x408x128xf32>
    %c0_5 = arith.constant 0 : index
    %c0_6 = arith.constant 0 : index
    %c0_7 = arith.constant 0 : index
    %6 = vector.load %arg3[%c0_5, %c0_6, %c0_7] : memref<1x408x128xf32, #tpu.memory_space<vmem>>, vector<1x408x128xf32>
    tpu.vector_store %arg3[%c0_5, %c0_6, %c0_7], %5 {strides = array<i32>} : memref<1x408x128xf32, #tpu.memory_space<vmem>>, vector<1x408x128xf32>,
    %7 = vector.shape_cast %4 : vector<408x128xf32> to vector<17x24x128xf32>
    %8 = vector.extract_strided_slice %7 {offsets = [0, 0, 0], sizes = [16, 16, 128], strides = [1, 1, 1]} : vector<17x24x128xf32> to vector<16x16x128xf32>
    %cst_8 = arith.constant dense<0.000000e+00> : vector<128xf32>
    %9 = vector.multi_reduction <add>, %8, %cst_8 [0, 1] : vector<16x16x128xf32> to vector<128xf32>
    %10 = vector.shape_cast %9 : vector<128xf32> to vector<1x128xf32>
    %c0_9 = arith.constant 0 : index
    %c0_10 = arith.constant 0 : index
    %c0_11 = arith.constant 0 : index
    %11 = vector.load %arg4[%c0_9, %c0_10, %c0_11] : memref<1x8x128xf32, #tpu.memory_space<vmem>>, vector<1x1x128xf32>
    %12 = vector.shape_cast %11 : vector<1x1x128xf32> to vector<1x128xf32>
    %13 = vector.shape_cast %10 : vector<1x128xf32> to vector<1x1x128xf32>
    tpu.vector_store %arg4[%c0_9, %c0_10, %c0_11], %13 {strides = array<i32>} : memref<1x8x128xf32, #tpu.memory_space<vmem>>, vector<1x1x128xf32>,
    %14 = arith.mulf %8, %8 : vector<16x16x128xf32>
    %cst_12 = arith.constant dense<0.000000e+00> : vector<128xf32>
    %15 = vector.multi_reduction <add>, %14, %cst_12 [0, 1] : vector<16x16x128xf32> to vector<128xf32>
    %16 = vector.shape_cast %15 : vector<128xf32> to vector<1x128xf32>
    %c0_13 = arith.constant 0 : index
    %c4 = arith.constant 4 : index
    %c0_14 = arith.constant 0 : index
    %17 = vector.load %arg4[%c0_13, %c4, %c0_14] : memref<1x8x128xf32, #tpu.memory_space<vmem>>, vector<1x1x128xf32>
    %18 = vector.shape_cast %17 : vector<1x1x128xf32> to vector<1x128xf32>
    %19 = vector.shape_cast %16 : vector<1x128xf32> to vector<1x1x128xf32>
    tpu.vector_store %arg4[%c0_13, %c4, %c0_14], %19 {strides = array<i32>} : memref<1x8x128xf32, #tpu.memory_space<vmem>>, vector<1x1x128xf32>,
    %20 = vector.extract_strided_slice %7 {offsets = [0, 1, 0], sizes = [16, 16, 128], strides = [1, 1, 1]} : vector<17x24x128xf32> to vector<16x16x128xf32>
    %cst_15 = arith.constant dense<0.000000e+00> : vector<128xf32>
    %21 = vector.multi_reduction <add>, %20, %cst_15 [0, 1] : vector<16x16x128xf32> to vector<128xf32>
    %22 = vector.shape_cast %21 : vector<128xf32> to vector<1x128xf32>
    %c0_16 = arith.constant 0 : index
    %c1 = arith.constant 1 : index
    %c0_17 = arith.constant 0 : index
    %23 = vector.load %arg4[%c0_16, %c1, %c0_17] : memref<1x8x128xf32, #tpu.memory_space<vmem>>, vector<1x1x128xf32>
    %24 = vector.shape_cast %23 : vector<1x1x128xf32> to vector<1x128xf32>
    %25 = vector.shape_cast %22 : vector<1x128xf32> to vector<1x1x128xf32>
    tpu.vector_store %arg4[%c0_16, %c1, %c0_17], %25 {strides = array<i32>} : memref<1x8x128xf32, #tpu.memory_space<vmem>>, vector<1x1x128xf32>,
    %26 = arith.mulf %20, %20 : vector<16x16x128xf32>
    %cst_18 = arith.constant dense<0.000000e+00> : vector<128xf32>
    %27 = vector.multi_reduction <add>, %26, %cst_18 [0, 1] : vector<16x16x128xf32> to vector<128xf32>
    %28 = vector.shape_cast %27 : vector<128xf32> to vector<1x128xf32>
    %c0_19 = arith.constant 0 : index
    %c5 = arith.constant 5 : index
    %c0_20 = arith.constant 0 : index
    %29 = vector.load %arg4[%c0_19, %c5, %c0_20] : memref<1x8x128xf32, #tpu.memory_space<vmem>>, vector<1x1x128xf32>
    %30 = vector.shape_cast %29 : vector<1x1x128xf32> to vector<1x128xf32>
    %31 = vector.shape_cast %28 : vector<1x128xf32> to vector<1x1x128xf32>
    tpu.vector_store %arg4[%c0_19, %c5, %c0_20], %31 {strides = array<i32>} : memref<1x8x128xf32, #tpu.memory_space<vmem>>, vector<1x1x128xf32>,
    %32 = vector.extract_strided_slice %7 {offsets = [1, 0, 0], sizes = [16, 16, 128], strides = [1, 1, 1]} : vector<17x24x128xf32> to vector<16x16x128xf32>
    %cst_21 = arith.constant dense<0.000000e+00> : vector<128xf32>
    %33 = vector.multi_reduction <add>, %32, %cst_21 [0, 1] : vector<16x16x128xf32> to vector<128xf32>
    %34 = vector.shape_cast %33 : vector<128xf32> to vector<1x128xf32>
    %c0_22 = arith.constant 0 : index
    %c2 = arith.constant 2 : index
    %c0_23 = arith.constant 0 : index
    %35 = vector.load %arg4[%c0_22, %c2, %c0_23] : memref<1x8x128xf32, #tpu.memory_space<vmem>>, vector<1x1x128xf32>
    %36 = vector.shape_cast %35 : vector<1x1x128xf32> to vector<1x128xf32>
    %37 = vector.shape_cast %34 : vector<1x128xf32> to vector<1x1x128xf32>
    tpu.vector_store %arg4[%c0_22, %c2, %c0_23], %37 {strides = array<i32>} : memref<1x8x128xf32, #tpu.memory_space<vmem>>, vector<1x1x128xf32>,
    %38 = arith.mulf %32, %32 : vector<16x16x128xf32>
    %cst_24 = arith.constant dense<0.000000e+00> : vector<128xf32>
    %39 = vector.multi_reduction <add>, %38, %cst_24 [0, 1] : vector<16x16x128xf32> to vector<128xf32>
    %40 = vector.shape_cast %39 : vector<128xf32> to vector<1x128xf32>
    %c0_25 = arith.constant 0 : index
    %c6 = arith.constant 6 : index
    %c0_26 = arith.constant 0 : index
    %41 = vector.load %arg4[%c0_25, %c6, %c0_26] : memref<1x8x128xf32, #tpu.memory_space<vmem>>, vector<1x1x128xf32>
    %42 = vector.shape_cast %41 : vector<1x1x128xf32> to vector<1x128xf32>
    %43 = vector.shape_cast %40 : vector<1x128xf32> to vector<1x1x128xf32>
    tpu.vector_store %arg4[%c0_25, %c6, %c0_26], %43 {strides = array<i32>} : memref<1x8x128xf32, #tpu.memory_space<vmem>>, vector<1x1x128xf32>,
    %44 = vector.extract_strided_slice %7 {offsets = [1, 1, 0], sizes = [16, 16, 128], strides = [1, 1, 1]} : vector<17x24x128xf32> to vector<16x16x128xf32>
    %cst_27 = arith.constant dense<0.000000e+00> : vector<128xf32>
    %45 = vector.multi_reduction <add>, %44, %cst_27 [0, 1] : vector<16x16x128xf32> to vector<128xf32>
    %46 = vector.shape_cast %45 : vector<128xf32> to vector<1x128xf32>
    %c0_28 = arith.constant 0 : index
    %c3 = arith.constant 3 : index
    %c0_29 = arith.constant 0 : index
    %47 = vector.load %arg4[%c0_28, %c3, %c0_29] : memref<1x8x128xf32, #tpu.memory_space<vmem>>, vector<1x1x128xf32>
    %48 = vector.shape_cast %47 : vector<1x1x128xf32> to vector<1x128xf32>
    %49 = vector.shape_cast %46 : vector<1x128xf32> to vector<1x1x128xf32>
    tpu.vector_store %arg4[%c0_28, %c3, %c0_29], %49 {strides = array<i32>} : memref<1x8x128xf32, #tpu.memory_space<vmem>>, vector<1x1x128xf32>,
    %50 = arith.mulf %44, %44 : vector<16x16x128xf32>
    %cst_30 = arith.constant dense<0.000000e+00> : vector<128xf32>
    %51 = vector.multi_reduction <add>, %50, %cst_30 [0, 1] : vector<16x16x128xf32> to vector<128xf32>
    %52 = vector.shape_cast %51 : vector<128xf32> to vector<1x128xf32>
    %c0_31 = arith.constant 0 : index
    %c7 = arith.constant 7 : index
    %c0_32 = arith.constant 0 : index
    %53 = vector.load %arg4[%c0_31, %c7, %c0_32] : memref<1x8x128xf32, #tpu.memory_space<vmem>>, vector<1x1x128xf32>
    %54 = vector.shape_cast %53 : vector<1x1x128xf32> to vector<1x128xf32>
    %55 = vector.shape_cast %52 : vector<1x128xf32> to vector<1x1x128xf32>
    tpu.vector_store %arg4[%c0_31, %c7, %c0_32], %55 {strides = array<i32>} : memref<1x8x128xf32, #tpu.memory_space<vmem>>, vector<1x1x128xf32>,
    return
  }
  func.func @transform_0(%arg0: i32) -> (i32, i32, i32, i32) {
    %c0_i32 = arith.constant 0 : i32
    %c0_i32_0 = arith.constant 0 : i32
    %c0_i32_1 = arith.constant 0 : i32
    %c0_i32_2 = arith.constant 0 : i32
    return %arg0, %c0_i32, %c0_i32_0, %c0_i32_1 : i32, i32, i32, i32
  }
  func.func @transform_1(%arg0: i32) -> (i32, i32) {
    %c0_i32 = arith.constant 0 : i32
    %c0_i32_0 = arith.constant 0 : i32
    %c0_i32_1 = arith.constant 0 : i32
    return %c0_i32, %c0_i32_0 : i32, i32
  }
  func.func @transform_2(%arg0: i32) -> (i32, i32, i32) {
    %c0_i32 = arith.constant 0 : i32
    %c0_i32_0 = arith.constant 0 : i32
    %c0_i32_1 = arith.constant 0 : i32
    return %arg0, %c0_i32, %c0_i32_0 : i32, i32, i32
  }
  func.func @transform_3(%arg0: i32) -> (i32, i32, i32) {
    %c0_i32 = arith.constant 0 : i32
    %c0_i32_0 = arith.constant 0 : i32
    %c0_i32_1 = arith.constant 0 : i32
    return %arg0, %c0_i32, %c0_i32_0 : i32, i32, i32
  }
}

</mosaic_0001>

<bundles_post_ra>
// kernel: _upblock_forward.1
= control target key start
LH: loop header
LB: loop body
LE: loop exit
PB: predicated region body
PF: predicated region fallthrough
CT: control target
= control target key end

     0   :  { %s1347_s12 = smov 0   ;;  %s2282_s0 = inlined_call_operand.vmem [shape: f32[2,17,24,128], index: 0, kind: input, shape index: {}]   ;;  %s2283_s1 = inlined_call_operand.vmem [shape: f32[128,128], index: 1, kind: input, shape index: {}]   ;;  %s2284_s2 = inlined_call_operand.vmem [shape: f32[2,408,128], index: 2, kind: output, shape index: {0}]   ;;  %s2285_s3 = inlined_call_operand.vmem [shape: f32[2,8,128], index: 3, kind: output, shape index: {1}]  }
   0x1 LB: > { %s1252_s13 = sadd.s32 4294967295, %s1325_s12   ;;  %p1256_p0 = scmp.ge.s32.totalorder %s1325_s12, 1  ;;  %s1325_s12 = sphi %s1347_s12, %s14_s12  }
   0x2   : > { %p140_p1 = scmp.lt.s32.totalorder %s1325_s12, 3 }
   0x4   : > { %p141_p2 = pnand %p1256_p0, %p140_p1 }
   0x6   : > { %144 = sbr.rel (%p141_p2) target bundleno = 349 (0x15d), region = 28 }
   0xb   : > { %v248_v0 = vld [vmem:[%s2283_s1 + $0x78] sm:$0xff]  ;;  %v247_v1 = vld [vmem:[%s2283_s1 + $0x70] sm:$0xff]  ;;  %v246_v2 = vld [vmem:[%s2283_s1 + $0x68] sm:$0xff]  ;;  %p168_p3 = scmp.lt.s32.totalorder %s1252_s13, 1  ;;  %vm626_vm0 = vcmask 1046528  }
   0xc   : > { %249 = vmatpush.msra.mxu0 %v248_v0  ;;  %1262 = vmatpush.msra.mxu1 %v248_v0  ;;  %v245_v3 = vld [vmem:[%s2283_s1 + $0x60] sm:$0xff]  ;;  %v244_v4 = vld [vmem:[%s2283_s1 + $0x58] sm:$0xff]  ;;  %v243_v5 = vld [vmem:[%s2283_s1 + $0x50] sm:$0xff] }
   0xd   : > { %1263 = vmatpush.msra.mxu2 %v248_v0  ;;  %1264 = vmatpush.msra.mxu3 %v248_v0  ;;  %v242_v6 = vld [vmem:[%s2283_s1 + $0x48] sm:$0xff]  ;;  %v241_v7 = vld [vmem:[%s2283_s1 + $0x40] sm:$0xff]  ;;  %v240_v8 = vld [vmem:[%s2283_s1 + $0x38] sm:$0xff]  ;;  %s2469_s13 = smov (!%p168_p3, %s1252_s13), 1 }
   0xe   : > { %250 = vmatpush.msra.mxu0 %v247_v1  ;;  %1265 = vmatpush.msra.mxu1 %v247_v1  ;;  %v239_v9 = vld [vmem:[%s2283_s1 + $0x30] sm:$0xff]  ;;  %v238_v10 = vld [vmem:[%s2283_s1 + $0x28] sm:$0xff]  ;;  %v237_v11 = vld [vmem:[%s2283_s1 + $0x20] sm:$0xff]  ;;  %s1310_s15 = smul.u32 408, %s2469_s13  ;;  %s1259_s28 = sshll.u32 %s2469_s13, 3 }
   0xf   : > { %1266 = vmatpush.msra.mxu2 %v247_v1  ;;  %1267 = vmatpush.msra.mxu3 %v247_v1  ;;  %v236_v12 = vld [vmem:[%s2283_s1 + $0x18] sm:$0xff]  ;;  %v235_v13 = vld [vmem:[%s2283_s1 + $0x10] sm:$0xff]  ;;  %v234_v14 = vld [vmem:[%s2283_s1 + $0x8] sm:$0xff]  ;;  %s2257_s4 = scalar_lea.vmem %s2285_s3, %s1259_s28 }
  0x10   : > { %251 = vmatpush.msra.mxu0 %v246_v2  ;;  %1268 = vmatpush.msra.mxu1 %v246_v2  ;;  %s1412_s22 = scalar_lea.vmem %s2282_s0, %s1310_s15  ;;  %v233_v15 = vld [vmem:[%s2283_s1] sm:$0xff]  ;;  %s1473_s27 = scalar_lea.vmem %s2284_s2, %s1310_s15 }
  0x11   : > { %1269 = vmatpush.msra.mxu2 %v246_v2  ;;  %1270 = vmatpush.msra.mxu3 %v246_v2  ;;  %v182_v16 = vld [vmem:[%s1412_s22] sm:$0xff]  ;;  %v195_v17 = vld [vmem:[%s1412_s22 + $0x68] sm:$0xff]  ;;  %v220_v19 = vld [vmem:[%s1412_s22 + $0x130] sm:$0xff] }
  0x12   : > { %252 = vmatpush.msra.mxu0 %v245_v3  ;;  %1271 = vmatpush.msra.mxu1 %v245_v3  ;;  %v207_v18 = vld [vmem:[%s1412_s22 + $0xc8] sm:$0xff]  ;;  %v196_v21 = vld [vmem:[%s1412_s22 + $0x70] sm:$0xff]  ;;  %v221_v23 = vld [vmem:[%s1412_s22 + $0x138] sm:$0xff] }
  0x13   : > { %1272 = vmatpush.msra.mxu2 %v245_v3  ;;  %1273 = vmatpush.msra.mxu3 %v245_v3  ;;  %v183_v20 = vld [vmem:[%s1412_s22 + $0x8] sm:$0xff]  ;;  %v208_v22 = vld [vmem:[%s1412_s22 + $0xd0] sm:$0xff]  ;;  %v197_v25 = vld [vmem:[%s1412_s22 + $0x78] sm:$0xff] }
  0x14   : > { %253 = vmatpush.msra.mxu0 %v244_v4  ;;  %1274 = vmatpush.msra.mxu1 %v244_v4  ;;  %v184_v24 = vld [vmem:[%s1412_s22 + $0x10] sm:$0xff]  ;;  %v209_v26 = vld [vmem:[%s1412_s22 + $0xd8] sm:$0xff]  ;;  %v222_v27 = vld [vmem:[%s1412_s22 + $0x140] sm:$0xff] }
  0x15   : > { %1275 = vmatpush.msra.mxu2 %v244_v4  ;;  %1276 = vmatpush.msra.mxu3 %v244_v4  ;;  %v185_v28 = vld [vmem:[%s1412_s22 + $0x18] sm:$0xff]  ;;  %v198_v29 = vld [vmem:[%s1412_s22 + $0x80] sm:$0xff]  ;;  %v223_v31 = vld [vmem:[%s1412_s22 + $0x148] sm:$0xff] }
  0x16   : > { %254 = vmatpush.msra.mxu0 %v243_v5  ;;  %1277 = vmatpush.msra.mxu1 %v243_v5  ;;  %v210_v30 = vld [vmem:[%s1412_s22 + $0xe0] sm:$0xff]  ;;  %v199_v33 = vld [vmem:[%s1412_s22 + $0x88] sm:$0xff]  ;;  %v224_v35 = vld [vmem:[%s1412_s22 + $0x150] sm:$0xff] }
  0x17   : > { %1278 = vmatpush.msra.mxu2 %v243_v5  ;;  %1279 = vmatpush.msra.mxu3 %v243_v5  ;;  %v186_v32 = vld [vmem:[%s1412_s22 + $0x20] sm:$0xff]  ;;  %v211_v34 = vld [vmem:[%s1412_s22 + $0xe8] sm:$0xff]  ;;  %v200_v37 = vld [vmem:[%s1412_s22 + $0x90] sm:$0xff] }
  0x18   : > { %255 = vmatpush.msra.mxu0 %v242_v6  ;;  %1280 = vmatpush.msra.mxu1 %v242_v6  ;;  %v187_v36 = vld [vmem:[%s1412_s22 + $0x28] sm:$0xff]  ;;  %v212_v38 = vld [vmem:[%s1412_s22 + $0xf0] sm:$0xff]  ;;  %v225_v39 = vld [vmem:[%s1412_s22 + $0x158] sm:$0xff] }
  0x19   : > { %1281 = vmatpush.msra.mxu2 %v242_v6  ;;  %1282 = vmatpush.msra.mxu3 %v242_v6  ;;  %v188_v40 = vld [vmem:[%s1412_s22 + $0x30] sm:$0xff]  ;;  %v201_v41 = vld [vmem:[%s1412_s22 + $0x98] sm:$0xff]  ;;  %v226_v43 = vld [vmem:[%s1412_s22 + $0x160] sm:$0xff] }
  0x1a   : > { %256 = vmatpush.msra.mxu0 %v241_v7  ;;  %1283 = vmatpush.msra.mxu1 %v241_v7  ;;  %v213_v42 = vld [vmem:[%s1412_s22 + $0xf8] sm:$0xff]  ;;  %v202_v45 = vld [vmem:[%s1412_s22 + $0xa0] sm:$0xff]  ;;  %v227_v47 = vld [vmem:[%s1412_s22 + $0x168] sm:$0xff] }
  0x1b   : > { %1284 = vmatpush.msra.mxu2 %v241_v7  ;;  %1285 = vmatpush.msra.mxu3 %v241_v7  ;;  %v189_v44 = vld [vmem:[%s1412_s22 + $0x38] sm:$0xff]  ;;  %v214_v46 = vld [vmem:[%s1412_s22 + $0x100] sm:$0xff]  ;;  %v203_v49 = vld [vmem:[%s1412_s22 + $0xa8] sm:$0xff] }
  0x1c   : > { %257 = vmatpush.msra.mxu0 %v240_v8  ;;  %1286 = vmatpush.msra.mxu1 %v240_v8  ;;  %v190_v48 = vld [vmem:[%s1412_s22 + $0x40] sm:$0xff]  ;;  %v215_v50 = vld [vmem:[%s1412_s22 + $0x108] sm:$0xff]  ;;  %v228_v51 = vld [vmem:[%s1412_s22 + $0x170] sm:$0xff] }
  0x1d   : > { %1287 = vmatpush.msra.mxu2 %v240_v8  ;;  %1288 = vmatpush.msra.mxu3 %v240_v8  ;;  %v191_v52 = vld [vmem:[%s1412_s22 + $0x48] sm:$0xff]  ;;  %v204_v53 = vld [vmem:[%s1412_s22 + $0xb0] sm:$0xff]  ;;  %v229_v55 = vld [vmem:[%s1412_s22 + $0x178] sm:$0xff] }
  0x1e   : > { %258 = vmatpush.msra.mxu0 %v239_v9  ;;  %1289 = vmatpush.msra.mxu1 %v239_v9  ;;  %v216_v54 = vld [vmem:[%s1412_s22 + $0x110] sm:$0xff]  ;;  %v205_v57 = vld [vmem:[%s1412_s22 + $0xb8] sm:$0xff]  ;;  %v230_v59 = vld [vmem:[%s1412_s22 + $0x180] sm:$0xff] }
  0x1f   : > { %1290 = vmatpush.msra.mxu2 %v239_v9  ;;  %1291 = vmatpush.msra.mxu3 %v239_v9  ;;  %v192_v56 = vld [vmem:[%s1412_s22 + $0x50] sm:$0xff]  ;;  %v217_v58 = vld [vmem:[%s1412_s22 + $0x118] sm:$0xff]  ;;  %v206_v61 = vld [vmem:[%s1412_s22 + $0xc0] sm:$0xff] }
  0x20   : > { %259 = vmatpush.msra.mxu0 %v238_v10  ;;  %1292 = vmatpush.msra.mxu1 %v238_v10  ;;  %v193_v60 = vld [vmem:[%s1412_s22 + $0x58] sm:$0xff]  ;;  %v218_v62 = vld [vmem:[%s1412_s22 + $0x120] sm:$0xff]  ;;  %v231_v63 = vld [vmem:[%s1412_s22 + $0x188] sm:$0xff] }
  0x21   : > { %1293 = vmatpush.msra.mxu2 %v238_v10  ;;  %1294 = vmatpush.msra.mxu3 %v238_v10  ;;  %v194_v0 = vld [vmem:[%s1412_s22 + $0x60] sm:$0xff]  ;;  %v219_v1 = vld [vmem:[%s1412_s22 + $0x128] sm:$0xff]  ;;  %v232_v2 = vld [vmem:[%s1412_s22 + $0x190] sm:$0xff] }
  0x22   : > { %260 = vmatpush.msra.mxu0 %v237_v11  ;;  %1295 = vmatpush.msra.mxu1 %v237_v11 }
  0x23   : > { %1296 = vmatpush.msra.mxu2 %v237_v11  ;;  %1297 = vmatpush.msra.mxu3 %v237_v11 }
  0x24   : > { %261 = vmatpush.msra.mxu0 %v236_v12  ;;  %1298 = vmatpush.msra.mxu1 %v236_v12 }
  0x25   : > { %1299 = vmatpush.msra.mxu2 %v236_v12  ;;  %1300 = vmatpush.msra.mxu3 %v236_v12 }
  0x26   : > { %262 = vmatpush.msra.mxu0 %v235_v13  ;;  %1301 = vmatpush.msra.mxu1 %v235_v13 }
  0x27   : > { %1302 = vmatpush.msra.mxu2 %v235_v13  ;;  %1303 = vmatpush.msra.mxu3 %v235_v13 }
  0x28   : > { %263 = vmatpush.msra.mxu0 %v234_v14  ;;  %1304 = vmatpush.msra.mxu1 %v234_v14 }
  0x29   : > { %1305 = vmatpush.msra.mxu2 %v234_v14  ;;  %1306 = vmatpush.msra.mxu3 %v234_v14 }
  0x2a   : > { %264 = vmatpush.msra.mxu0 %v233_v15  ;;  %1307 = vmatpush.msra.mxu1 %v233_v15 }
  0x2b   : > { %1308 = vmatpush.msra.mxu2 %v233_v15  ;;  %265 = vmatmul.f32.vlgmr.msra.gmra.mxu0 %v182_v16 }
  0x2c   : > { %304 = vmatmul.f32.vlgmr.msra.gmra.mxu1 %v195_v17  ;;  %340 = vmatmul.f32.vlgmr.msra.gmra.mxu2 %v207_v18 }
  0x2d   : > { %1309 = vmatpush.msra.mxu3 %v233_v15 }
  0x2e   : > { %379 = vmatmul.f32.vlgmr.msra.gmra.mxu3 %v220_v19 }
  0x33   : > { %268 = vmatmul.f32.gmra.mxu0 %v183_v20 }
  0x34   : > { %307 = vmatmul.f32.gmra.mxu1 %v196_v21  ;;  %343 = vmatmul.f32.gmra.mxu2 %v208_v22 }
  0x36   : > { %382 = vmatmul.f32.gmra.mxu3 %v221_v23 }
  0x3b   : > { %271 = vmatmul.f32.gmra.mxu0 %v184_v24 }
  0x3c   : > { %310 = vmatmul.f32.gmra.mxu1 %v197_v25  ;;  %346 = vmatmul.f32.gmra.mxu2 %v209_v26 }
  0x3e   : > { %385 = vmatmul.f32.gmra.mxu3 %v222_v27 }
  0x43   : > { %274 = vmatmul.f32.gmra.mxu0 %v185_v28 }
  0x44   : > { %313 = vmatmul.f32.gmra.mxu1 %v198_v29  ;;  %349 = vmatmul.f32.gmra.mxu2 %v210_v30 }
  0x46   : > { %388 = vmatmul.f32.gmra.mxu3 %v223_v31 }
  0x4b   : > { %277 = vmatmul.f32.gmra.mxu0 %v186_v32 }
  0x4c   : > { %316 = vmatmul.f32.gmra.mxu1 %v199_v33  ;;  %352 = vmatmul.f32.gmra.mxu2 %v211_v34 }
  0x4e   : > { %391 = vmatmul.f32.gmra.mxu3 %v224_v35 }
  0x53   : > { %280 = vmatmul.f32.gmra.mxu0 %v187_v36 }
  0x54   : > { %319 = vmatmul.f32.gmra.mxu1 %v200_v37  ;;  %355 = vmatmul.f32.gmra.mxu2 %v212_v38 }
  0x56   : > { %394 = vmatmul.f32.gmra.mxu3 %v225_v39 }
  0x5b   : > { %283 = vmatmul.f32.gmra.mxu0 %v188_v40 }
  0x5c   : > { %322 = vmatmul.f32.gmra.mxu1 %v201_v41  ;;  %358 = vmatmul.f32.gmra.mxu2 %v213_v42 }
  0x5e   : > { %397 = vmatmul.f32.gmra.mxu3 %v226_v43 }
  0x63   : > { %286 = vmatmul.f32.gmra.mxu0 %v189_v44 }
  0x64   : > { %325 = vmatmul.f32.gmra.mxu1 %v202_v45  ;;  %361 = vmatmul.f32.gmra.mxu2 %v214_v46 }
  0x66   : > { %400 = vmatmul.f32.gmra.mxu3 %v227_v47 }
  0x6b   : > { %289 = vmatmul.f32.gmra.mxu0 %v190_v48 }
  0x6c   : > { %328 = vmatmul.f32.gmra.mxu1 %v203_v49  ;;  %364 = vmatmul.f32.gmra.mxu2 %v215_v50 }
  0x6e   : > { %403 = vmatmul.f32.gmra.mxu3 %v228_v51 }
  0x73   : > { %292 = vmatmul.f32.gmra.mxu0 %v191_v52 }
  0x74   : > { %331 = vmatmul.f32.gmra.mxu1 %v204_v53  ;;  %367 = vmatmul.f32.gmra.mxu2 %v216_v54 }
  0x76   : > { %406 = vmatmul.f32.gmra.mxu3 %v229_v55 }
  0x7b   : > { %295 = vmatmul.f32.gmra.mxu0 %v192_v56 }
  0x7c   : > { %334 = vmatmul.f32.gmra.mxu1 %v205_v57  ;;  %370 = vmatmul.f32.gmra.mxu2 %v217_v58 }
  0x7e   : > { %409 = vmatmul.f32.gmra.mxu3 %v230_v59 }
  0x83   : > { %298 = vmatmul.f32.gmra.mxu0 %v193_v60 }
  0x84   : > { %337 = vmatmul.f32.gmra.mxu1 %v206_v61  ;;  %373 = vmatmul.f32.gmra.mxu2 %v218_v62 }
  0x86   : > { %412 = vmatmul.f32.gmra.mxu3 %v231_v63 }
  0x8b   : > { %301 = vmatmul.f32.gmra.mxu0 %v194_v0 }
  0x8c   : > { %376 = vmatmul.f32.gmra.mxu2 %v219_v1 }
  0x8e   : > { %415 = vmatmul.f32.gmra.mxu3 %v232_v2 }
  0xa8   : > { %v266_v3 = vpop.f32.mrf.mxu0 }
  0xa9   : > { %419 = vst [vmem:[%s1473_s27] sm:$0xff] %v266_v3  ;;  %v1476_v4 = vpop.f32.mrf.mxu1  ;;  %v508_v5 = vmul.f32 %v266_v3, %v266_v3  ;;  %v627_v8 = vrot.slane %v266_v3, 1 }
  0xaa   : > { %432 = vst [vmem:[%s1473_s27 + $0x68] sm:$0xff] %v1476_v4  ;;  %v1549_v38 = vmul.f32 %v1476_v4, %v1476_v4  ;;  %v2287_v44 = vrot.slane %v1476_v4, 1 }
  0xab   : > { %v841_v13 = vrot.slane %v508_v5, 1 }
  0xac   : > { %v2286_v47 = vrot.slane %v1549_v38, 1 }
  0xaf   : > { %v1480_v6 = vpop.f32.mrf.mxu2 }
  0xb0   : > { %444 = vst [vmem:[%s1473_s27 + $0xc8] sm:$0xff] %v1480_v6  ;;  %v269_v7 = vpop.f32.mrf.mxu0  ;;  %v1557_v41 = vmul.f32 %v1480_v6, %v1480_v6  ;;  %v2289_v50 = vrot.slane %v1480_v6, 1 }
  0xb1   : > { %420 = vst [vmem:[%s1473_s27 + $0x8] sm:$0xff] %v269_v7  ;;  %v1485_v9 = vadd.f32 %v269_v7, %v266_v3  ;;  %v509_v10 = vmul.f32 %v269_v7, %v269_v7  ;;  %v628_v11 = vrot.slane %v269_v7, 1  ;;  %v1487_v12 = vpop.f32.mrf.mxu1  ;;  %v1494_v17 = vpop.f32.mrf.mxu3 }
  0xb2   : > { %433 = vst [vmem:[%s1473_s27 + $0x70] sm:$0xff] %v1487_v12  ;;  %v781_v39 = vmul.f32 %v1487_v12, %v1487_v12  ;;  %v650_v45 = vrot.slane %v1487_v12, 1  ;;  %v1574_v49 = vmul.f32 %v1494_v17, %v1494_v17  ;;  %v2288_v53 = vrot.slane %v1557_v41, 1 }
  0xb3   : > { %v1491_v14 = vadd.f32 %v509_v10, %v508_v5  ;;  %v842_v15 = vrot.slane %v509_v10, 1  ;;  %v629_v16 = vsel %vm626_vm0, %v627_v8, %v628_v11  ;;  %2362 = vst [vmem:[#allocation2_spill] sm:$0xff] %v1494_v17 }
  0xb4   : > { %457 = vst [vmem:[%s1473_s27 + $0x130] sm:$0xff] %v1494_v17  ;;  %v864_v48 = vrot.slane %v781_v39, 1  ;;  %v1589_v56 = vsel %vm626_vm0, %v2287_v44, %v650_v45 }
  0xb5   : > { %v843_v18 = vsel %vm626_vm0, %v841_v13, %v842_v15  ;;  %2367 = vst [vmem:[#allocation7_spill] sm:$0xff] %v1574_v49 }
  0xb6   : > { %v1602_v59 = vsel %vm626_vm0, %v2286_v47, %v864_v48 }
  0xb7   : > { %v344_v19 = vpop.f32.mrf.mxu2 }
  0xb8   : > { %445 = vst [vmem:[%s1473_s27 + $0xd0] sm:$0xff] %v344_v19  ;;  %v272_v20 = vpop.f32.mrf.mxu0  ;;  %v785_v42 = vmul.f32 %v344_v19, %v344_v19  ;;  %v670_v51 = vrot.slane %v344_v19, 1 }
  0xb9   : > { %421 = vst [vmem:[%s1473_s27 + $0x10] sm:$0xff] %v272_v20  ;;  %v630_v21 = vrot.slane %v272_v20, 1  ;;  %v777_v22 = vmul.f32 %v272_v20, %v272_v20  ;;  %v1501_v23 = vpop.f32.mrf.mxu1  ;;  %v1506_v26 = vpop.f32.mrf.mxu3 }
  0xba   : > { %434 = vst [vmem:[%s1473_s27 + $0x78] sm:$0xff] %v1501_v23  ;;  %v884_v54 = vrot.slane %v785_v42, 1  ;;  %v1582_v55 = vmul.f32 %v1501_v23, %v1501_v23  ;;  %v1597_v58 = vmul.f32 %v1506_v26, %v1506_v26  ;;  %v1613_v63 = vsel %vm626_vm0, %v2289_v50, %v670_v51 }
  0xbb   : > { %v631_v24 = vsel %vm626_vm0, %v628_v11, %v630_v21  ;;  %v844_v25 = vrot.slane %v777_v22, 1  ;;  %2363 = vst [vmem:[#allocation3_spill] sm:$0xff] %v1506_v26  ;;  %v652_v0 = vrot.slane %v1501_v23, 1  ;;  %v692_v11 = vrot.slane %v1506_v26, 1 }
  0xbc   : > { %v1508_v27 = vadd.f32 %v631_v24, %v629_v16  ;;  %458 = vst [vmem:[%s1473_s27 + $0x138] sm:$0xff] %v1506_v26  ;;  %v1627_v5 = vsel %vm626_vm0, %v2288_v53, %v884_v54  ;;  %v866_v7 = vrot.slane %v1582_v55, 1 }
  0xbd   : > { %v845_v28 = vsel %vm626_vm0, %v842_v15, %v844_v25  ;;  %2369 = vst [vmem:[#allocation9_spill] sm:$0xff] %v1597_v58 }
  0xbe   : > { %v1513_v29 = vadd.f32 %v845_v28, %v843_v18  ;;  %2371 = vst [vmem:[#allocation11_spill] sm:$0xff] %v1613_v63  ;;  %v906_v18 = vrot.slane %v1597_v58, 1 }
  0xbf   : > { %v1515_v30 = vpop.f32.mrf.mxu2  ;;  %2374 = vst [vmem:[#allocation14_spill] sm:$0xff] %v1627_v5 }
  0xc0   : > { %2364 = vst [vmem:[#allocation4_spill] sm:$0xff] %v1515_v30  ;;  %v1519_v31 = vpop.f32.mrf.mxu0  ;;  %v1618_v1 = vmul.f32 %v1515_v30, %v1515_v30  ;;  %v672_v12 = vrot.slane %v1515_v30, 1 }
  0xc1   : > { %446 = vst [vmem:[%s1473_s27 + $0xd8] sm:$0xff] %v1515_v30  ;;  %v1523_v32 = vpop.f32.mrf.mxu1  ;;  %v1527_v33 = vpop.f32.mrf.mxu3  ;;  %v510_v2 = vmul.f32 %v1519_v31, %v1519_v31  ;;  %v471_v19 = vadd.f32 %v1485_v9, %v1519_v31  ;;  %v632_v20 = vrot.slane %v1519_v31, 1 }
  0xc2   : > { %422 = vst [vmem:[%s1473_s27 + $0x18] sm:$0xff] %v1519_v31  ;;  %v1593_v57 = vmul.f32 %v1523_v32, %v1523_v32  ;;  %v1608_v62 = vmul.f32 %v1527_v33, %v1527_v33  ;;  %v653_v8 = vrot.slane %v1523_v32, 1  ;;  %v693_v21 = vrot.slane %v1527_v33, 1 }
  0xc3   : > { %435 = vst [vmem:[%s1473_s27 + $0x80] sm:$0xff] %v1523_v32  ;;  %v886_v24 = vrot.slane %v1618_v1, 1  ;;  %v541_v25 = vadd.f32 %v1491_v14, %v510_v2  ;;  %v846_v28 = vrot.slane %v510_v2, 1 }
  0xc4   : > { %2365 = vst [vmem:[#allocation5_spill] sm:$0xff] %v1527_v33  ;;  %v867_v15 = vrot.slane %v1593_v57, 1  ;;  %v907_v22 = vrot.slane %v1608_v62, 1  ;;  %v1661_v9 = vsel %vm626_vm0, %v652_v0, %v653_v8  ;;  %v1680_v44 = vsel %vm626_vm0, %v692_v11, %v693_v21 }
  0xc5   : > { %459 = vst [vmem:[%s1473_s27 + $0x140] sm:$0xff] %v1527_v33 }
  0xc6   : > { %2370 = vst [vmem:[#allocation10_spill] sm:$0xff] %v1608_v62  ;;  %v1670_v14 = vsel %vm626_vm0, %v866_v7, %v867_v15  ;;  %v1683_v7 = vsel %vm626_vm0, %v906_v18, %v907_v22 }
  0xc7   : > { %v1531_v34 = vpop.f32.mrf.mxu2  ;;  %2372 = vst [vmem:[#allocation12_spill] sm:$0xff] %v1618_v1 }
  0xc8   : > { %2366 = vst [vmem:[#allocation6_spill] sm:$0xff] %v1531_v34  ;;  %v1535_v35 = vpop.f32.mrf.mxu0  ;;  %v1656_v39 = vmul.f32 %v1531_v34, %v1531_v34  ;;  %v673_v45 = vrot.slane %v1531_v34, 1 }
  0xc9   : > { %447 = vst [vmem:[%s1473_s27 + $0xe0] sm:$0xff] %v1531_v34  ;;  %v1539_v36 = vpop.f32.mrf.mxu1  ;;  %v1543_v37 = vpop.f32.mrf.mxu3  ;;  %v511_v13 = vmul.f32 %v1535_v35, %v1535_v35  ;;  %v633_v48 = vrot.slane %v1535_v35, 1  ;;  %v472_v53 = vadd.f32 %v471_v19, %v1535_v35  ;;  %v991_v50 = vadd.f32 %v1535_v35, %v1519_v31 }
  0xca   : > { %423 = vst [vmem:[%s1473_s27 + $0x20] sm:$0xff] %v1535_v35  ;;  %v782_v51 = vmul.f32 %v1539_v36, %v1539_v36  ;;  %v790_v0 = vmul.f32 %v1543_v37, %v1543_v37  ;;  %v655_v60 = vrot.slane %v1539_v36, 1  ;;  %v887_v62 = vrot.slane %v1656_v39, 1 }
  0xcb   : > { %436 = vst [vmem:[%s1473_s27 + $0x88] sm:$0xff] %v1539_v36  ;;  %v847_v61 = vrot.slane %v511_v13, 1  ;;  %v1693_v33 = vsel %vm626_vm0, %v672_v12, %v673_v45  ;;  %v695_v19 = vrot.slane %v1543_v37, 1  ;;  %v542_v26 = vadd.f32 %v541_v25, %v511_v13 }
  0xcc   : > { %460 = vst [vmem:[%s1473_s27 + $0x148] sm:$0xff] %v1543_v37  ;;  %v869_v11 = vrot.slane %v782_v51, 1  ;;  %v909_v12 = vrot.slane %v790_v0, 1  ;;  %v1031_v51 = vadd.f32 %v511_v13, %v510_v2  ;;  %v1713_v37 = vsel %vm626_vm0, %v886_v24, %v887_v62 }
  0xcd   : > { %2375 = vst [vmem:[#allocation15_spill] sm:$0xff] %v1656_v39  ;;  %v848_v35 = vsel %vm626_vm0, %v846_v28, %v847_v61 }
  0xce   : > { %2377 = vst [vmem:[#allocation17_spill] sm:$0xff] %v1680_v44  ;;  %v634_v44 = vsel %vm626_vm0, %v632_v20, %v633_v48  ;;  %v1708_v20 = vsel %vm626_vm0, %v653_v8, %v655_v60  ;;  %v1722_v2 = vsel %vm626_vm0, %v867_v15, %v869_v11  ;;  %v954_v60 = vadd.f32 %v1513_v29, %v848_v35 }
  0xcf   : > { %v1553_v40 = vpop.f32.mrf.mxu2  ;;  %2378 = vst [vmem:[#allocation18_spill] sm:$0xff] %v1683_v7  ;;  %v740_v28 = vadd.f32 %v1508_v27, %v634_v44  ;;  %v1743_v29 = vsel %vm626_vm0, %v907_v22, %v909_v12 }
  0xd0   : > { %448 = vst [vmem:[%s1473_s27 + $0xe8] sm:$0xff] %v1553_v40  ;;  %v1561_v43 = vpop.f32.mrf.mxu0  ;;  %v786_v47 = vmul.f32 %v1553_v40, %v1553_v40  ;;  %v675_v31 = vrot.slane %v1553_v40, 1 }
  0xd1   : > { %424 = vst [vmem:[%s1473_s27 + $0x28] sm:$0xff] %v1561_v43  ;;  %v1567_v46 = vpop.f32.mrf.mxu1  ;;  %v1577_v52 = vpop.f32.mrf.mxu3  ;;  %v778_v54 = vmul.f32 %v1561_v43, %v1561_v43  ;;  %v635_v58 = vrot.slane %v1561_v43, 1 }
  0xd2   : > { %437 = vst [vmem:[%s1473_s27 + $0x90] sm:$0xff] %v1567_v46  ;;  %v1730_v8 = vmul.f32 %v1577_v52, %v1577_v52  ;;  %v1735_v27 = vsel %vm626_vm0, %v673_v45, %v675_v31  ;;  %v657_v45 = vrot.slane %v1567_v46, 1 }
  0xd3   : > { %2368 = vst [vmem:[#allocation8_spill] sm:$0xff] %v1577_v52  ;;  %v849_v43 = vrot.slane %v778_v54, 1  ;;  %v636_v40 = vsel %vm626_vm0, %v633_v48, %v635_v58  ;;  %v1719_v54 = vmul.f32 %v1567_v46, %v1567_v46 }
  0xd4   : > { %461 = vst [vmem:[%s1473_s27 + $0x150] sm:$0xff] %v1577_v52  ;;  %v1750_v24 = vadd.f32 %v740_v28, %v636_v40  ;;  %v1752_v25 = vadd.f32 %v636_v40, %v634_v44 }
  0xd5   : > { %2380 = vst [vmem:[#allocation20_spill] sm:$0xff] %v1693_v33  ;;  %v889_v33 = vrot.slane %v786_v47, 1  ;;  %v1726_v47 = vsel %vm626_vm0, %v693_v21, %v695_v19  ;;  %v850_v58 = vsel %vm626_vm0, %v847_v61, %v849_v43  ;;  %v871_v61 = vrot.slane %v1719_v54, 1 }
  0xd6   : > { %2381 = vst [vmem:[#allocation21_spill] sm:$0xff] %v1713_v37  ;;  %v1767_v44 = vadd.f32 %v850_v58, %v848_v35 }
  0xd7   : > { %v1622_v3 = vpop.f32.mrf.mxu2  ;;  %2382 = vst [vmem:[#allocation22_spill] sm:$0xff] %v1726_v47  ;;  %v1748_v21 = vsel %vm626_vm0, %v887_v62, %v889_v33  ;;  %v697_v33 = vrot.slane %v1577_v52, 1  ;;  %v1765_v62 = vadd.f32 %v954_v60, %v850_v58 }
  0xd8   : > { %2373 = vst [vmem:[#allocation13_spill] sm:$0xff] %v1622_v3  ;;  %v1633_v10 = vpop.f32.mrf.mxu0  ;;  %v1758_v48 = vmul.f32 %v1622_v3, %v1622_v3  ;;  %v677_v11 = vrot.slane %v1622_v3, 1 }
  0xd9   : > { %449 = vst [vmem:[%s1473_s27 + $0xf0] sm:$0xff] %v1622_v3  ;;  %v1642_v16 = vpop.f32.mrf.mxu1  ;;  %v1658_v42 = vpop.f32.mrf.mxu3  ;;  %v512_v22 = vmul.f32 %v1633_v10, %v1633_v10  ;;  %v473_v43 = vadd.f32 %v472_v53, %v1633_v10  ;;  %v637_v35 = vrot.slane %v1633_v10, 1  ;;  %v992_v58 = vadd.f32 %v991_v50, %v1633_v10 }
  0xda   : > { %425 = vst [vmem:[%s1473_s27 + $0x30] sm:$0xff] %v1633_v10  ;;  %v1740_v15 = vmul.f32 %v1642_v16, %v1642_v16  ;;  %v658_v12 = vrot.slane %v1642_v16, 1  ;;  %v1787_v53 = vmul.f32 %v1658_v42, %v1658_v42  ;;  %v698_v31 = vrot.slane %v1658_v42, 1 }
  0xdb   : > { %438 = vst [vmem:[%s1473_s27 + $0x98] sm:$0xff] %v1642_v16  ;;  %v543_v47 = vadd.f32 %v542_v26, %v512_v22  ;;  %v851_v52 = vrot.slane %v512_v22, 1 }
  0xdc   : > { %2376 = vst [vmem:[#allocation16_spill] sm:$0xff] %v1658_v42  ;;  %v872_v28 = vrot.slane %v1740_v15, 1 }
  0xdd   : > { %462 = vst [vmem:[%s1473_s27 + $0x158] sm:$0xff] %v1658_v42  ;;  %v1802_v42 = vsel %vm626_vm0, %v657_v45, %v658_v12  ;;  %v912_v45 = vrot.slane %v1787_v53, 1 }
  0xde   : > { %2383 = vst [vmem:[#allocation23_spill] sm:$0xff] %v1730_v8  ;;  %v1805_v26 = vsel %vm626_vm0, %v871_v61, %v872_v28 }
  0xdf   : > { %v1690_v36 = vpop.f32.mrf.mxu2  ;;  %2384 = vst [vmem:[#allocation24_spill] sm:$0xff] %v1735_v27  ;;  %v1032_v27 = vadd.f32 %v1031_v51, %v512_v22  ;;  %v1812_v22 = vsel %vm626_vm0, %v697_v33, %v698_v31 }
  0xe0   : > { %2379 = vst [vmem:[#allocation19_spill] sm:$0xff] %v1690_v36  ;;  %v1698_v18 = vpop.f32.mrf.mxu0  ;;  %v678_v50 = vrot.slane %v1690_v36, 1 }
  0xe1   : > { %450 = vst [vmem:[%s1473_s27 + $0xf8] sm:$0xff] %v1690_v36  ;;  %v1705_v7 = vpop.f32.mrf.mxu1  ;;  %v1732_v13 = vpop.f32.mrf.mxu3  ;;  %v513_v40 = vmul.f32 %v1698_v18, %v1698_v18  ;;  %v638_v10 = vrot.slane %v1698_v18, 1  ;;  %v474_v61 = vadd.f32 %v473_v43, %v1698_v18  ;;  %v993_v5 = vadd.f32 %v992_v58, %v1698_v18 }
  0xe2   : > { %426 = vst [vmem:[%s1473_s27 + $0x38] sm:$0xff] %v1698_v18  ;;  %v783_v37 = vmul.f32 %v1705_v7, %v1705_v7  ;;  %v660_v49 = vrot.slane %v1705_v7, 1  ;;  %v1824_v33 = vsel %vm626_vm0, %v677_v11, %v678_v50 }
  0xe3   : > { %439 = vst [vmem:[%s1473_s27 + $0xa0] sm:$0xff] %v1705_v7  ;;  %v852_v3 = vrot.slane %v513_v40, 1  ;;  %v639_v34 = vsel %vm626_vm0, %v637_v35, %v638_v10  ;;  %v544_v43 = vadd.f32 %v543_v47, %v513_v40  ;;  %v1033_v11 = vadd.f32 %v1032_v27, %v513_v40 }
  0xe4   : > { %2385 = vst [vmem:[#allocation25_spill] sm:$0xff] %v1743_v29  ;;  %v891_v29 = vrot.slane %v1758_v48, 1  ;;  %v1841_v35 = vsel %vm626_vm0, %v658_v12, %v660_v49 }
  0xe5   : > { %463 = vst [vmem:[%s1473_s27 + $0x160] sm:$0xff] %v1732_v13  ;;  %v853_v18 = vsel %vm626_vm0, %v851_v52, %v852_v3  ;;  %v742_v52 = vadd.f32 %v1750_v24, %v639_v34 }
  0xe6   : > { %2386 = vst [vmem:[#allocation26_spill] sm:$0xff] %v1748_v21  ;;  %v1793_v21 = vmul.f32 %v1690_v36, %v1690_v36  ;;  %v791_v36 = vmul.f32 %v1732_v13, %v1732_v13 }
  0xe7   : > { %2387 = vst [vmem:[#allocation27_spill] sm:$0xff] %v1758_v48  ;;  %v1762_v0 = vpop.f32.mrf.mxu2 }
  0xe8   : > { %451 = vst [vmem:[%s1473_s27 + $0x100] sm:$0xff] %v1762_v0  ;;  %v290_v19 = vpop.f32.mrf.mxu0  ;;  %v787_v51 = vmul.f32 %v1762_v0, %v1762_v0  ;;  %v892_v63 = vrot.slane %v1793_v21, 1 }
  0xe9   : > { %427 = vst [vmem:[%s1473_s27 + $0x40] sm:$0xff] %v290_v19  ;;  %v1779_v60 = vpop.f32.mrf.mxu1  ;;  %v1799_v39 = vpop.f32.mrf.mxu3  ;;  %v779_v48 = vmul.f32 %v290_v19, %v290_v19  ;;  %v640_v17 = vrot.slane %v290_v19, 1  ;;  %v914_v19 = vrot.slane %v791_v36, 1  ;;  %v1080_v36 = vadd.f32 %v1752_v25, %v639_v34 }
  0xea   : > { %440 = vst [vmem:[%s1473_s27 + $0xa8] sm:$0xff] %v1779_v60  ;;  %v1844_v47 = vsel %vm626_vm0, %v891_v29, %v892_v63  ;;  %v1129_v29 = vadd.f32 %v1767_v44, %v853_v18  ;;  %v662_v34 = vrot.slane %v1779_v60, 1 }
  0xeb   : > { %2388 = vst [vmem:[#allocation28_spill] sm:$0xff] %v1787_v53  ;;  %v854_v7 = vrot.slane %v779_v48, 1  ;;  %v1849_v48 = vmul.f32 %v1779_v60, %v1779_v60  ;;  %v641_v27 = vsel %vm626_vm0, %v638_v10, %v640_v17 }
  0xec   : > { %2389 = vst [vmem:[#allocation29_spill] sm:$0xff] %v1793_v21  ;;  %v700_v21 = vrot.slane %v1732_v13, 1  ;;  %v1876_v25 = vadd.f32 %v742_v52, %v641_v27 }
  0xed   : > { %2390 = vst [vmem:[#allocation30_spill] sm:$0xff] %v1799_v39  ;;  %v855_v49 = vsel %vm626_vm0, %v852_v3, %v854_v7  ;;  %v1874_v3 = vsel %vm626_vm0, %v912_v45, %v914_v19  ;;  %v876_v44 = vrot.slane %v1849_v48, 1 }
  0xee   : > { %464 = vst [vmem:[%s1473_s27 + $0x168] sm:$0xff] %v1799_v39  ;;  %v1864_v12 = vsel %vm626_vm0, %v698_v31, %v700_v21 }
  0xef   : > { %2391 = vst [vmem:[#allocation31_spill] sm:$0xff] %v1812_v22  ;;  %v1821_v1 = vpop.f32.mrf.mxu2  ;;  %v874_v22 = vrot.slane %v783_v37, 1  ;;  %v680_v37 = vrot.slane %v1762_v0, 1  ;;  %v956_v0 = vadd.f32 %v1765_v62, %v853_v18  ;;  %v1878_v62 = vadd.f32 %v1080_v36, %v641_v27 }
  0xf0   : > { %2392 = vst [vmem:[#allocation32_spill] sm:$0xff] %v1821_v1  ;;  %v1829_v53 = vpop.f32.mrf.mxu0  ;;  %v1883_v21 = vmul.f32 %v1821_v1, %v1821_v1 }
  0xf1   : > { %2393 = vst [vmem:[#allocation33_spill] sm:$0xff] %v1824_v33  ;;  %v1834_v58 = vpop.f32.mrf.mxu1  ;;  %v894_v33 = vrot.slane %v787_v51, 1  ;;  %v1852_v13 = vsel %vm626_vm0, %v872_v28, %v874_v22  ;;  %v1867_v40 = vsel %vm626_vm0, %v678_v50, %v680_v37  ;;  %v1889_v28 = vadd.f32 %v1129_v29, %v855_v49 }
  0xf2   : > { %452 = vst [vmem:[%s1473_s27 + $0x108] sm:$0xff] %v1821_v1  ;;  %v1861_v24 = vmul.f32 %v1834_v58, %v1834_v58  ;;  %v514_v50 = vmul.f32 %v1829_v53, %v1829_v53  ;;  %v2401_v51 = vrot.slane %v1730_v8, 1  ;;  %v475_v18 = vadd.f32 %v474_v61, %v1829_v53 }
  0xf3   : > { %428 = vst [vmem:[%s1473_s27 + $0x48] sm:$0xff] %v1829_v53  ;;  %v1870_v17 = vsel %vm626_vm0, %v892_v63, %v894_v33  ;;  %v1887_v63 = vadd.f32 %v956_v0, %v855_v49  ;;  %v682_v33 = vrot.slane %v1821_v1, 1  ;;  %v663_v7 = vrot.slane %v1834_v58, 1 }
  0xf4   : > { %441 = vst [vmem:[%s1473_s27 + $0xb0] sm:$0xff] %v1834_v58  ;;  %v1898_v22 = vsel %vm626_vm0, %v2401_v51, %v912_v45  ;;  %v877_v19 = vrot.slane %v1861_v24, 1  ;;  %v642_v52 = vrot.slane %v1829_v53, 1  ;;  %v994_v27 = vadd.f32 %v993_v5, %v1829_v53 }
  0xf5   : > { %2394 = vst [vmem:[#allocation34_spill] sm:$0xff] %v1844_v47  ;;  %v1910_v45 = vmul.f32 %v1799_v39, %v1799_v39  ;;  %v896_v36 = vrot.slane %v1883_v21, 1  ;;  %v545_v51 = vadd.f32 %v544_v43, %v514_v50  ;;  %v1919_v5 = vsel %vm626_vm0, %v662_v34, %v663_v7 }
  0xf6   : > { %2395 = vst [vmem:[#allocation35_spill] sm:$0xff] %v1864_v12  ;;  %v1034_v12 = vadd.f32 %v1033_v11, %v514_v50  ;;  %v1922_v8 = vsel %vm626_vm0, %v876_v44, %v877_v19  ;;  %v1931_v44 = vpop.f32.mrf.mxu3 }
  0xf7   : > { %2396 = vst [vmem:[#allocation36_spill] sm:$0xff] %v1867_v40  ;;  %v1885_v31 = vpop.f32.mrf.mxu2 }
  0xf8   : > { %2397 = vst [vmem:[#allocation37_spill] sm:$0xff] %v1870_v17  ;;  %v296_v10 = vpop.f32.mrf.mxu0  ;;  %v1915_v61 = vmul.f32 %v1885_v31, %v1885_v31  ;;  %v683_v49 = vrot.slane %v1885_v31, 1  ;;  %v702_v17 = vrot.slane %v1799_v39, 1 }
  0xf9   : > { %2398 = vst [vmem:[#allocation38_spill] sm:$0xff] %v1874_v3  ;;  %v335_v37 = vpop.f32.mrf.mxu1  ;;  %v515_v0 = vmul.f32 %v296_v10, %v296_v10  ;;  %v643_v29 = vrot.slane %v296_v10, 1  ;;  %v856_v3 = vrot.slane %v514_v50, 1  ;;  %v995_v47 = vadd.f32 %v994_v27, %v296_v10 }
  0xfa   : > { %2399 = vst [vmem:[#allocation39_spill] sm:$0xff] %v1883_v21  ;;  %v665_v53 = vrot.slane %v335_v37, 1  ;;  %v476_v21 = vadd.f32 %v475_v18, %v296_v10  ;;  %v1927_v43 = vsel %vm626_vm0, %v682_v33, %v683_v49  ;;  %v897_v50 = vrot.slane %v1915_v61, 1 }
  0xfb   : > { %2400 = vst [vmem:[#allocation40_spill] sm:$0xff] %v1885_v31  ;;  %v857_v40 = vrot.slane %v515_v0, 1  ;;  %v644_v34 = vsel %vm626_vm0, %v642_v52, %v643_v29  ;;  %v1936_v27 = vmul.f32 %v1931_v44, %v1931_v44 }
  0xfc   : > { %453 = vst [vmem:[%s1473_s27 + $0x110] sm:$0xff] %v1885_v31  ;;  %v916_v31 = vrot.slane %v1910_v45, 1  ;;  %v1939_v33 = vsel %vm626_vm0, %v663_v7, %v665_v53  ;;  %v744_v30 = vadd.f32 %v1876_v25, %v644_v34 }
  0xfd   : > { %2402 = vst [vmem:[#allocation41_spill] sm:$0xff] %v1898_v22  ;;  %v784_v22 = vmul.f32 %v335_v37, %v335_v37 }
  0xfe   : > { %429 = vst [vmem:[%s1473_s27 + $0x50] sm:$0xff] %v296_v10  ;;  %v1035_v10 = vadd.f32 %v1034_v12, %v515_v0 }
  0xff   : > { %442 = vst [vmem:[%s1473_s27 + $0xb8] sm:$0xff] %v335_v37  ;;  %v371_v11 = vpop.f32.mrf.mxu2  ;;  %v546_v37 = vadd.f32 %v545_v51, %v515_v0  ;;  %v879_v1 = vrot.slane %v784_v22, 1  ;;  %v858_v22 = vsel %vm626_vm0, %v856_v3, %v857_v40  ;;  %v703_v0 = vrot.slane %v1931_v44, 1 }
 0x100   : > { %2403 = vst [vmem:[#allocation42_spill] sm:$0xff] %v1910_v45  ;;  %v788_v39 = vmul.f32 %v371_v11, %v371_v11  ;;  %v299_v18 = vpop.f32.mrf.mxu0  ;;  %v685_v45 = vrot.slane %v371_v11, 1  ;;  %v1961_v3 = vsel %vm626_vm0, %v896_v36, %v897_v50 }
 0x101   : > { %2404 = vst [vmem:[#allocation43_spill] sm:$0xff] %v1915_v61  ;;  %v645_v52 = vrot.slane %v299_v18, 1  ;;  %v780_v51 = vmul.f32 %v299_v18, %v299_v18  ;;  %v1976_v25 = vsel %vm626_vm0, %v702_v17, %v703_v0 }
 0x102   : > { %2405 = vst [vmem:[#allocation44_spill] sm:$0xff] %v1922_v8  ;;  %v899_v61 = vrot.slane %v788_v39, 1  ;;  %v1958_v39 = vsel %vm626_vm0, %v877_v19, %v879_v1  ;;  %v1082_v8 = vadd.f32 %v1878_v62, %v644_v34 }
 0x103   : > { %2406 = vst [vmem:[#allocation45_spill] sm:$0xff] %v1927_v43  ;;  %v1942_v43 = vpop.f32.mrf.mxu1  ;;  %v646_v7 = vsel %vm626_vm0, %v643_v29, %v645_v52  ;;  %v859_v53 = vrot.slane %v780_v51, 1  ;;  %v1966_v29 = vsel %vm626_vm0, %v683_v49, %v685_v45  ;;  %v958_v51 = vadd.f32 %v1887_v63, %v858_v22 }
 0x104   : > { %2407 = vst [vmem:[#allocation46_spill] sm:$0xff] %v1931_v44  ;;  %v1949_v12 = vmul.f32 %v1942_v43, %v1942_v43  ;;  %v1972_v1 = vsel %vm626_vm0, %v897_v50, %v899_v61  ;;  %v745_v19 = vadd.f32 %v744_v30, %v646_v7  ;;  %v1083_v34 = vadd.f32 %v1082_v8, %v646_v7 }
 0x105   : > { %454 = vst [vmem:[%s1473_s27 + $0x118] sm:$0xff] %v371_v11  ;;  %v667_v11 = vrot.slane %v1942_v43, 1  ;;  %v860_v52 = vsel %vm626_vm0, %v857_v40, %v859_v53  ;;  %v2410_v45 = vrot.slane %v1480_v6, 1  ;;  %v2411_v61 = vrot.slane %v1936_v27, 1 }
 0x106   : > { %2408 = vst [vmem:[#allocation47_spill] sm:$0xff] %v1936_v27  ;;  %v881_v36 = vrot.slane %v1949_v12, 1  ;;  %v959_v62 = vadd.f32 %v958_v51, %v860_v52 }
 0x107   : > { %430 = vst [vmem:[%s1473_s27 + $0x58] sm:$0xff] %v299_v18  ;;  %v1131_v18 = vadd.f32 %v1889_v28, %v858_v22  ;;  %v1981_v40 = vsel %vm626_vm0, %v667_v11, %v2410_v45  ;;  %v1983_v63 = vpop.f32.mrf.mxu2  ;;  %v407_v28 = vpop.f32.mrf.mxu3  ;;  %v1988_v30 = vsel %vm626_vm0, %v916_v31, %v2411_v61  ;;  %v2413_v45 = vrot.slane %v1557_v41, 1 }
 0x108   : > { %443 = vst [vmem:[%s1473_s27 + $0xc0] sm:$0xff] %v1942_v43  ;;  %v1994_v8 = vmul.f32 %v1983_v63, %v1983_v63  ;;  %v302_v17 = vpop.f32.mrf.mxu0  ;;  %v705_v50 = vrot.slane %v407_v28, 1  ;;  %v1996_v22 = vmul.f32 %v407_v28, %v407_v28 }
 0x109   : > { %465 = vst [vmem:[%s1473_s27 + $0x170] sm:$0xff] %v1931_v44  ;;  %v1132_v49 = vadd.f32 %v1131_v18, %v860_v52  ;;  %v477_v7 = vadd.f32 %v476_v21, %v302_v17  ;;  %v516_v53 = vmul.f32 %v302_v17, %v302_v17  ;;  %v647_v11 = vrot.slane %v302_v17, 1 }
 0x10a   : > { %2409 = vst [vmem:[#allocation48_spill] sm:$0xff] %v1976_v25  ;;  %v996_v51 = vadd.f32 %v995_v47, %v302_v17  ;;  %v2002_v31 = vsel %vm626_vm0, %v881_v36, %v2413_v45  ;;  %v901_v52 = vrot.slane %v1994_v8, 1  ;;  %v2008_v61 = vsel %vm626_vm0, %v703_v0, %v705_v50 }
 0x10b   : > { %2412 = vst [vmem:[#allocation49_spill] sm:$0xff] %v1988_v30  ;;  %v478_v30 = vadd.f32 %v477_v7, %v1476_v4  ;;  %v547_v25 = vadd.f32 %v546_v37, %v516_v53  ;;  %v2414_v21 = vrot.slane %v1476_v4, 1  ;;  %v1036_v45 = vadd.f32 %v1035_v10, %v516_v53 }
 0x10c   : > { %455 = vst [vmem:[%s1473_s27 + $0x120] sm:$0xff] %v1983_v63  ;;  %v997_v36 = vadd.f32 %v996_v51, %v1476_v4  ;;  %v2415_v0 = vrot.slane %v1549_v38, 1  ;;  %v919_v37 = vrot.slane %v1996_v22, 1 }
 0x10d   : > { %431 = vst [vmem:[%s1473_s27 + $0x60] sm:$0xff] %v302_v17  ;;  %v649_v47 = vsel %vm626_vm0, %v647_v11, %v2414_v21  ;;  %v861_v17 = vrot.slane %v516_v53, 1  ;;  %v479_v18 = vadd.f32 %v478_v30, %v1501_v23  ;;  %v1037_v4 = vadd.f32 %v1036_v45, %v1549_v38 }
 0x10e   : > { %466 = vst [vmem:[%s1473_s27 + $0x178] sm:$0xff] %v407_v28  ;;  %v746_v44 = vadd.f32 %v745_v19, %v649_v47  ;;  %v1084_v27 = vadd.f32 %v1083_v34, %v649_v47  ;;  %v548_v28 = vadd.f32 %v547_v25, %v1549_v38  ;;  %v998_v19 = vadd.f32 %v997_v36, %v1501_v23 }
 0x10f   : > { %v863_v50 = vsel %vm626_vm0, %v861_v17, %v2415_v0  ;;  %v480_v10 = vadd.f32 %v479_v18, %v1523_v32  ;;  %v2027_v53 = vpop.f32.mrf.mxu2  ;;  %v1038_v23 = vadd.f32 %v1037_v4, %v1582_v55  ;;  %v2035_v38 = vpop.f32.mrf.mxu3 }
 0x110   : > { %v747_v7 = vadd.f32 %v746_v44, %v1589_v56  ;;  %v960_v11 = vadd.f32 %v959_v62, %v863_v50  ;;  %v549_v34 = vadd.f32 %v548_v28, %v1582_v55  ;;  %v1085_v25 = vadd.f32 %v1084_v27, %v1589_v56  ;;  %456 = vst [vmem:[%s1473_s27 + $0x128] sm:$0xff] %v2027_v53 }
 0x111   : > { %v1133_v30 = vadd.f32 %v1132_v49, %v863_v50  ;;  %v999_v44 = vadd.f32 %v998_v19, %v1523_v32  ;;  %v481_v62 = vadd.f32 %v480_v10, %v1567_v46  ;;  %467 = vst [vmem:[%s1473_s27 + $0x180] sm:$0xff] %v2035_v38  ;;  %v1039_v47 = vadd.f32 %v1038_v23, %v1593_v57 }
 0x112   : > { %v748_v51 = vadd.f32 %v747_v7, %v1661_v9  ;;  %v961_v21 = vadd.f32 %v960_v11, %v1602_v59  ;;  %v550_v18 = vadd.f32 %v549_v34, %v1593_v57  ;;  %v1086_v56 = vadd.f32 %v1085_v25, %v1661_v9 }
 0x113   : > { %v1134_v27 = vadd.f32 %v1133_v30, %v1602_v59  ;;  %v1000_v55 = vadd.f32 %v999_v44, %v1567_v46  ;;  %v482_v17 = vadd.f32 %v481_v62, %v1642_v16  ;;  %v1040_v50 = vadd.f32 %v1039_v47, %v1719_v54  ;;  %v2416_v44 = vld [vmem:[#allocation44_spill] sm:$0xff] }
 0x114   : > { %v749_v49 = vadd.f32 %v748_v51, %v1708_v20  ;;  %v962_v32 = vadd.f32 %v961_v21, %v1670_v14  ;;  %v551_v36 = vadd.f32 %v550_v18, %v1719_v54  ;;  %v1087_v45 = vadd.f32 %v1086_v56, %v1708_v20 }
 0x115   : > { %v1135_v9 = vadd.f32 %v1134_v27, %v1670_v14  ;;  %v1001_v0 = vadd.f32 %v1000_v55, %v1642_v16  ;;  %v483_v46 = vadd.f32 %v482_v17, %v1779_v60  ;;  %v1041_v4 = vadd.f32 %v1040_v50, %v1740_v15  ;;  %v2422_v50 = vld [vmem:[#allocation12_spill] sm:$0xff] }
 0x116   : > { %v750_v59 = vadd.f32 %v749_v49, %v1802_v42  ;;  %v963_v28 = vadd.f32 %v962_v32, %v1722_v2  ;;  %v552_v57 = vadd.f32 %v551_v36, %v1740_v15  ;;  %v1088_v7 = vadd.f32 %v1087_v45, %v1802_v42  ;;  %v2417_v49 = vld [vmem:[#allocation4_spill] sm:$0xff] }
 0x117   : > { %v1136_v11 = vadd.f32 %v1135_v9, %v1722_v2  ;;  %v1002_v19 = vadd.f32 %v1001_v0, %v1779_v60  ;;  %v484_v16 = vadd.f32 %v483_v46, %v1834_v58  ;;  %v1042_v30 = vadd.f32 %v1041_v4, %v1849_v48 }
 0x118   : > { %v751_v20 = vadd.f32 %v750_v59, %v1841_v35  ;;  %v964_v14 = vadd.f32 %v963_v28, %v1805_v26  ;;  %v553_v54 = vadd.f32 %v552_v57, %v1849_v48  ;;  %v1089_v10 = vadd.f32 %v1088_v7, %v1841_v35  ;;  %v2106_v59 = vpop.f32.mrf.mxu3  ;;  %v2421_v28 = vld [vmem:[#allocation6_spill] sm:$0xff]  ;;  %v2423_v57 = vld [vmem:[#allocation11_spill] sm:$0xff] }
 0x119   : > { %v1137_v34 = vadd.f32 %v1136_v11, %v1805_v26  ;;  %v1003_v25 = vadd.f32 %v1002_v19, %v1834_v58  ;;  %v485_v60 = vadd.f32 %v484_v16, %v1942_v43  ;;  %v1043_v62 = vadd.f32 %v1042_v30, %v1861_v24  ;;  %468 = vst [vmem:[%s1473_s27 + $0x188] sm:$0xff] %v2106_v59  ;;  %v2426_v16 = vld [vmem:[#allocation14_spill] sm:$0xff] }
 0x11a   : > { %v752_v42 = vadd.f32 %v751_v20, %v1919_v5  ;;  %v965_v2 = vadd.f32 %v964_v14, %v1852_v13  ;;  %v554_v15 = vadd.f32 %v553_v54, %v1861_v24  ;;  %v1090_v51 = vadd.f32 %v1089_v10, %v1919_v5  ;;  %v2424_v14 = vld [vmem:[#allocation7_spill] sm:$0xff] }
 0x11b   : > { %v1138_v21 = vadd.f32 %v1137_v34, %v1852_v13  ;;  %v1004_v23 = vadd.f32 %v1003_v25, %v1942_v43  ;;  %v486_v56 = vadd.f32 %v485_v60, %v1480_v6  ;;  %v1044_v13 = vadd.f32 %v1043_v62, %v1949_v12  ;;  %v2427_v34 = vld [vmem:[#allocation13_spill] sm:$0xff]  ;;  %v2429_v25 = vld [vmem:[#allocation20_spill] sm:$0xff] }
 0x11c   : > { %v753_v35 = vadd.f32 %v752_v42, %v1939_v33  ;;  %v966_v26 = vadd.f32 %v965_v2, %v2416_v44  ;;  %v555_v58 = vadd.f32 %v554_v15, %v1949_v12  ;;  %v1091_v48 = vadd.f32 %v1090_v51, %v1939_v33  ;;  %v2419_v12 = vld [vmem:[#allocation2_spill] sm:$0xff]  ;;  %v2428_v2 = vld [vmem:[#allocation15_spill] sm:$0xff]  ;;  %v2430_v15 = vld [vmem:[#allocation21_spill] sm:$0xff] }
 0x11d   : > { %v1139_v18 = vadd.f32 %v1138_v21, %v2416_v44  ;;  %v2087_v27 = vmul.f32 %v2027_v53, %v2027_v53  ;;  %v688_v43 = vrot.slane %v2027_v53, 1  ;;  %v487_v32 = vadd.f32 %v486_v56, %v2417_v49  ;;  %v2431_v44 = vld [vmem:[#allocation19_spill] sm:$0xff]  ;;  %v2433_v62 = vld [vmem:[#allocation24_spill] sm:$0xff]  ;;  %v2434_v56 = vld [vmem:[#allocation26_spill] sm:$0xff] }
 0x11e   : > { %v967_v5 = vadd.f32 %v966_v26, %v1958_v39  ;;  %v556_v33 = vadd.f32 %v555_v58, %v1557_v41  ;;  %v754_v55 = vadd.f32 %v753_v35, %v1981_v40  ;;  %v2418_v47 = vrot.slane %v1983_v63, 1 }
 0x11f   : > { %v1140_v24 = vadd.f32 %v1139_v18, %v1958_v39  ;;  %v2420_v36 = vrot.slane %v2419_v12, 1  ;;  %v902_v9 = vrot.slane %v2087_v27, 1  ;;  %v488_v0 = vadd.f32 %v487_v32, %v2421_v28  ;;  %v2435_v32 = vld [vmem:[#allocation32_spill] sm:$0xff] }
 0x120   : > { %v2097_v17 = vsel %vm626_vm0, %v2418_v47, %v688_v43  ;;  %v968_v39 = vadd.f32 %v967_v5, %v2002_v31  ;;  %v557_v46 = vadd.f32 %v556_v33, %v2422_v50  ;;  %v755_v7 = vadd.f32 %v754_v55, %v2423_v57  ;;  %v2438_v47 = vld [vmem:[#allocation34_spill] sm:$0xff] }
 0x121   : > { %v2102_v45 = vsel %vm626_vm0, %v688_v43, %v2420_v36  ;;  %v1005_v11 = vadd.f32 %v1004_v23, %v1480_v6  ;;  %v2117_v20 = vsel %vm626_vm0, %v901_v52, %v902_v9  ;;  %v2425_v19 = vrot.slane %v2424_v14, 1  ;;  %v2432_v23 = vld [vmem:[#allocation27_spill] sm:$0xff]  ;;  %v2442_v14 = vld [vmem:[#allocation37_spill] sm:$0xff] }
 0x122   : > { %v969_v54 = vadd.f32 %v968_v39, %v2426_v16  ;;  %v1045_v10 = vadd.f32 %v1044_v13, %v1557_v41  ;;  %v489_v42 = vadd.f32 %v488_v0, %v2427_v34  ;;  %v558_v6 = vadd.f32 %v557_v46, %v2428_v2 }
 0x123   : > { %v2122_v4 = vsel %vm626_vm0, %v902_v9, %v2425_v19  ;;  %v756_v30 = vadd.f32 %v755_v7, %v2429_v25  ;;  %v1006_v60 = vadd.f32 %v1005_v11, %v2417_v49  ;;  %v1092_v21 = vadd.f32 %v1091_v48, %v1981_v40  ;;  %v2436_v48 = vld [vmem:[#allocation29_spill] sm:$0xff] }
 0x124   : > { %v970_v52 = vadd.f32 %v969_v54, %v2430_v15  ;;  %v1046_v51 = vadd.f32 %v1045_v10, %v2422_v50  ;;  %v1141_v35 = vadd.f32 %v1140_v24, %v2002_v31  ;;  %v490_v26 = vadd.f32 %v489_v42, %v2431_v44  ;;  %v2437_v24 = vld [vmem:[#allocation33_spill] sm:$0xff]  ;;  %v2440_v50 = vld [vmem:[#allocation39_spill] sm:$0xff] }
 0x125   : > { %v559_v41 = vadd.f32 %v558_v6, %v2432_v23  ;;  %v757_v58 = vadd.f32 %v756_v30, %v2433_v62  ;;  %v1007_v18 = vadd.f32 %v1006_v60, %v2421_v28  ;;  %v1093_v43 = vadd.f32 %v1092_v21, %v2423_v57  ;;  %v2439_v28 = vld [vmem:[#allocation40_spill] sm:$0xff]  ;;  %v2443_v42 = vld [vmem:[#allocation43_spill] sm:$0xff]  ;;  %v2444_v6 = vld [vmem:[#allocation45_spill] sm:$0xff]  ;;  %v2162_v60 = vpop.f32.mrf.mxu3 }
 0x126   : > { %v971_v5 = vadd.f32 %v970_v52, %v2434_v56  ;;  %v1047_v13 = vadd.f32 %v1046_v51, %v2428_v2  ;;  %v1142_v49 = vadd.f32 %v1141_v35, %v2426_v16  ;;  %v491_v40 = vadd.f32 %v490_v26, %v2435_v32  ;;  %v2441_v57 = vld [vmem:[#allocation36_spill] sm:$0xff]  ;;  %469 = vst [vmem:[%s1473_s27 + $0x190] sm:$0xff] %v2162_v60 }
 0x127   : > { %v560_v31 = vadd.f32 %v559_v41, %v2436_v48  ;;  %v758_v33 = vadd.f32 %v757_v58, %v2437_v24  ;;  %v1008_v55 = vadd.f32 %v1007_v18, %v2427_v34  ;;  %v1094_v9 = vadd.f32 %v1093_v43, %v2429_v25 }
 0x128   : > { %v972_v12 = vadd.f32 %v971_v5, %v2438_v47  ;;  %v1048_v36 = vadd.f32 %v1047_v13, %v2432_v23  ;;  %v1143_v39 = vadd.f32 %v1142_v49, %v2430_v15  ;;  %v492_v0 = vadd.f32 %v491_v40, %v2439_v28 }
 0x129   : > { %v561_v46 = vadd.f32 %v560_v31, %v2440_v50  ;;  %v759_v7 = vadd.f32 %v758_v33, %v2441_v57  ;;  %v1009_v11 = vadd.f32 %v1008_v55, %v2431_v44  ;;  %v1095_v54 = vadd.f32 %v1094_v9, %v2433_v62  ;;  %v2447_v55 = vld [vmem:[#allocation9_spill] sm:$0xff] }
 0x12a   : > { %v973_v19 = vadd.f32 %v972_v12, %v2442_v14  ;;  %v1049_v16 = vadd.f32 %v1048_v36, %v2436_v48  ;;  %v1144_v10 = vadd.f32 %v1143_v39, %v2434_v56  ;;  %v493_v34 = vadd.f32 %v492_v0, %v1983_v63  ;;  %v2445_v56 = vld [vmem:[#allocation3_spill] sm:$0xff] }
 0x12b   : > { %v562_v2 = vadd.f32 %v561_v46, %v2443_v42  ;;  %v760_v25 = vadd.f32 %v759_v7, %v2444_v6  ;;  %v1010_v30 = vadd.f32 %v1009_v11, %v2435_v32  ;;  %v1096_v51 = vadd.f32 %v1095_v54, %v2437_v24  ;;  %v2446_v24 = vld [vmem:[#allocation5_spill] sm:$0xff]  ;;  %v2451_v11 = vld [vmem:[#allocation18_spill] sm:$0xff] }
 0x12c   : > { %v974_v15 = vadd.f32 %v973_v19, %v1961_v3  ;;  %v1050_v52 = vadd.f32 %v1049_v16, %v2440_v50  ;;  %v1145_v21 = vadd.f32 %v1144_v10, %v2438_v47  ;;  %v494_v35 = vadd.f32 %v493_v34, %v2027_v53  ;;  %v2449_v50 = vld [vmem:[#allocation10_spill] sm:$0xff]  ;;  %v2450_v46 = vld [vmem:[#allocation17_spill] sm:$0xff]  ;;  %v2452_v16 = vld [vmem:[#allocation23_spill] sm:$0xff] }
 0x12d   : > { %v563_v44 = vadd.f32 %v562_v2, %v1994_v8  ;;  %v761_v26 = vadd.f32 %v760_v25, %v1966_v29  ;;  %v1011_v23 = vadd.f32 %v1010_v30, %v2439_v28  ;;  %v1097_v58 = vadd.f32 %v1096_v51, %v2441_v57  ;;  %v2448_v28 = vld [vmem:[#allocation8_spill] sm:$0xff]  ;;  %v2453_v54 = vld [vmem:[#allocation22_spill] sm:$0xff]  ;;  %v2455_v30 = vld [vmem:[#allocation25_spill] sm:$0xff] }
 0x12e   : > { %v975_v41 = vadd.f32 %v974_v15, %v1972_v1  ;;  %v1051_v62 = vadd.f32 %v1050_v52, %v2443_v42  ;;  %v1146_v18 = vadd.f32 %v1145_v21, %v2442_v14  ;;  %v495_v5 = vadd.f32 %v494_v35, %v2445_v56  ;;  %v2454_v34 = vld [vmem:[#allocation16_spill] sm:$0xff]  ;;  %v2456_v52 = vld [vmem:[#allocation30_spill] sm:$0xff]  ;;  %v2458_v35 = vld [vmem:[#allocation31_spill] sm:$0xff] }
 0x12f   : > { %v564_v13 = vadd.f32 %v563_v44, %v2087_v27  ;;  %v762_v43 = vadd.f32 %v761_v26, %v2097_v17  ;;  %v1012_v49 = vadd.f32 %v1011_v23, %v1983_v63  ;;  %v1098_v48 = vadd.f32 %v1097_v58, %v2444_v6  ;;  %v2457_v51 = vld [vmem:[#allocation28_spill] sm:$0xff] }
 0x130   : > { %v976_v32 = vadd.f32 %v975_v41, %v2117_v20  ;;  %v1052_v40 = vadd.f32 %v1051_v62, %v1994_v8  ;;  %v1147_v31 = vadd.f32 %v1146_v18, %v1961_v3  ;;  %v496_v33 = vadd.f32 %v495_v5, %v2446_v24  ;;  %v2459_v41 = vld [vmem:[#allocation47_spill] sm:$0xff]  ;;  %v2461_v62 = vld [vmem:[#allocation41_spill] sm:$0xff]  ;;  %v2462_v18 = vld [vmem:[#allocation46_spill] sm:$0xff] }
 0x131   : > { %v565_v47 = vadd.f32 %v564_v13, %v2447_v55  ;;  %v763_v12 = vadd.f32 %v762_v43, %v2102_v45  ;;  %v1013_v36 = vadd.f32 %v1012_v49, %v2027_v53  ;;  %v1099_v39 = vadd.f32 %v1098_v48, %v1966_v29  ;;  %v2463_v5 = vld [vmem:[#allocation42_spill] sm:$0xff]  ;;  %v2464_v43 = vld [vmem:[#allocation35_spill] sm:$0xff] }
 0x132   : > { %v977_v9 = vadd.f32 %v976_v32, %v2122_v4  ;;  %v1053_v63 = vadd.f32 %v1052_v40, %v2087_v27  ;;  %v1148_v8 = vadd.f32 %v1147_v31, %v1972_v1  ;;  %v497_v0 = vadd.f32 %v496_v33, %v2448_v28  ;;  %v2465_v48 = vld [vmem:[#allocation38_spill] sm:$0xff] }
 0x133   : > { %v566_v3 = vadd.f32 %v565_v47, %v2449_v50  ;;  %v764_v57 = vadd.f32 %v763_v12, %v2450_v46  ;;  %v1014_v7 = vadd.f32 %v1013_v36, %v2445_v56  ;;  %v1100_v19 = vadd.f32 %v1099_v39, %v2097_v17  ;;  %v2467_v36 = vld [vmem:[#allocation49_spill] sm:$0xff] }
 0x134   : > { %v978_v14 = vadd.f32 %v977_v9, %v2451_v11  ;;  %v1054_v53 = vadd.f32 %v1053_v63, %v2447_v55  ;;  %v1149_v27 = vadd.f32 %v1148_v8, %v2117_v20  ;;  %v498_v42 = vadd.f32 %v497_v0, %v2454_v34  ;;  %v2466_v55 = vld [vmem:[#allocation48_spill] sm:$0xff] }
 0x135   : > { %v567_v29 = vadd.f32 %v566_v3, %v2452_v16  ;;  %v765_v1 = vadd.f32 %v764_v57, %v2453_v54  ;;  %v1015_v10 = vadd.f32 %v1014_v7, %v2446_v24  ;;  %v1101_v6 = vadd.f32 %v1100_v19, %v2102_v45 }
 0x136   : > { %v1055_v2 = vadd.f32 %v1054_v53, %v2449_v50  ;;  %v1150_v25 = vadd.f32 %v1149_v27, %v2122_v4  ;;  %v979_v15 = vadd.f32 %v978_v14, %v2455_v30  ;;  %v499_v20 = vadd.f32 %v498_v42, %v2456_v52 }
 0x137   : > { %v1016_v17 = vadd.f32 %v1015_v10, %v2448_v28  ;;  %v568_v21 = vadd.f32 %v567_v29, %v2457_v51  ;;  %v766_v44 = vadd.f32 %v765_v1, %v2458_v35  ;;  %v1102_v26 = vadd.f32 %v1101_v6, %v2450_v46 }
 0x138   : > { %v1151_v23 = vadd.f32 %v1150_v25, %v2451_v11  ;;  %v2460_v45 = vrot.slane %v2459_v41, 1  ;;  %v980_v58 = vadd.f32 %v979_v15, %v2461_v62  ;;  %v500_v56 = vadd.f32 %v499_v20, %v2462_v18 }
 0x139   : > { %v569_v13 = vadd.f32 %v568_v21, %v2463_v5  ;;  %v767_v49 = vadd.f32 %v766_v44, %v2464_v43  ;;  %v1017_v32 = vadd.f32 %v1016_v17, %v2454_v34  ;;  %v1103_v40 = vadd.f32 %v1102_v26, %v2453_v54 }
 0x13a   : > { %v2221_v4 = vsel %vm626_vm0, %v2460_v45, %v919_v37  ;;  %v981_v31 = vadd.f32 %v980_v58, %v2465_v48  ;;  %v1152_v22 = vadd.f32 %v1151_v23, %v2455_v30  ;;  %v1056_v24 = vadd.f32 %v1055_v2, %v2452_v16 }
 0x13b   : > { %v501_v37 = vrot.slane %v500_v56, 4  ;;  %v570_v33 = vadd.f32 %v569_v13, %v2459_v41  ;;  %v768_v47 = vadd.f32 %v767_v49, %v2466_v55  ;;  %v1018_v12 = vadd.f32 %v1017_v32, %v2456_v52 }
 0x13c   : > { %v982_v9 = vadd.f32 %v981_v31, %v2467_v36  ;;  %v1104_v63 = vadd.f32 %v1103_v40, %v2458_v35  ;;  %v1153_v39 = vadd.f32 %v1152_v22, %v2461_v62  ;;  %v1057_v8 = vadd.f32 %v1056_v24, %v2457_v51 }
 0x13d   : > { %v502_v28 = vadd.f32 %v501_v37, %v500_v56  ;;  %v571_v0 = vrot.slane %v570_v33, 4  ;;  %v769_v50 = vadd.f32 %v768_v47, %v2008_v61  ;;  %v1019_v3 = vadd.f32 %v1018_v12, %v2462_v18 }
 0x13e   : > { %v983_v46 = vadd.f32 %v982_v9, %v2221_v4  ;;  %v1105_v57 = vadd.f32 %v1104_v63, %v2464_v43  ;;  %v1154_v7 = vadd.f32 %v1153_v39, %v2465_v48  ;;  %v1058_v11 = vadd.f32 %v1057_v8, %v2463_v5 }
 0x13f   : > { %v503_v14 = vrot.slane %v502_v28, 2  ;;  %v572_v53 = vadd.f32 %v571_v0, %v570_v33  ;;  %v770_v19 = vrot.slane %v769_v50, 4  ;;  %v1029_v27 = vmul.f32 %v2035_v38, %v2035_v38 }
 0x140   : > { %v984_v16 = vrot.slane %v983_v46, 4  ;;  %v1106_v29 = vadd.f32 %v1105_v57, %v2466_v55  ;;  %v1020_v54 = vadd.f32 %v1019_v3, %v2035_v38  ;;  %v1059_v1 = vadd.f32 %v1058_v11, %v2459_v41 }
 0x141   : > { %v504_v10 = vadd.f32 %v503_v14, %v502_v28  ;;  %v573_v34 = vrot.slane %v572_v53, 2  ;;  %v771_v42 = vadd.f32 %v770_v19, %v769_v50  ;;  %v1155_v2 = vadd.f32 %v1154_v7, %v2467_v36 }
 0x142   : > { %v985_v6 = vadd.f32 %v984_v16, %v983_v46  ;;  %v1107_v25 = vadd.f32 %v1106_v29, %v2008_v61  ;;  %v1060_v30 = vadd.f32 %v1059_v1, %v1029_v27  ;;  %v1072_v15 = vrot.slane %v2035_v38, 1 }
 0x143   : > { %v505_v17 = vrot.slane %v504_v10, 1  ;;  %v574_v52 = vadd.f32 %v573_v34, %v572_v53  ;;  %v772_v20 = vrot.slane %v771_v42, 2  ;;  %v1121_v51 = vrot.slane %v1029_v27, 1 }
 0x144   : > { %v986_v21 = vrot.slane %v985_v6, 2  ;;  %v1021_v35 = vadd.f32 %v1020_v54, %v2106_v59  ;;  %v1030_v44 = vmul.f32 %v2106_v59, %v2106_v59  ;;  %v1073_v61 = vrot.slane %v2106_v59, 1 }
 0x145   : > { %v506_v26 = vadd.f32 %v505_v17, %v504_v10  ;;  %v575_v38 = vrot.slane %v574_v52, 1  ;;  %v773_v23 = vadd.f32 %v772_v20, %v771_v42  ;;  %v1075_v41 = vrot.slane %v2162_v60, 1 }
 0x146   : > { %v987_v45 = vadd.f32 %v986_v21, %v985_v6  ;;  %v1022_v62 = vrot.slane %v1021_v35, 4  ;;  %v1061_v58 = vadd.f32 %v1060_v30, %v1030_v44  ;;  %v1122_v18 = vrot.slane %v1030_v44, 1 }
 0x147   : > { %507 = vst [vmem:[%s2257_s4] sm:$0x1] %v506_v26  ;;  %v576_v56 = vadd.f32 %v575_v38, %v574_v52  ;;  %v774_v5 = vrot.slane %v773_v23, 1  ;;  %v1156_v13 = vadd.f32 %v1155_v2, %v2221_v4  ;;  %v1074_v43 = vsel %vm626_vm0, %v1072_v15, %v1073_v61 }
 0x148   : > { %v988_v49 = vrot.slane %v987_v45, 1  ;;  %v1023_v59 = vadd.f32 %v1022_v62, %v1021_v35  ;;  %v1062_v32 = vrot.slane %v1061_v58, 4  ;;  %v1108_v40 = vadd.f32 %v1107_v25, %v1074_v43 }
 0x149   : > { %577 = vst [vmem:[%s2257_s4 + $0x4] sm:$0x1] %v576_v56  ;;  %v775_v48 = vadd.f32 %v774_v5, %v773_v23  ;;  %v1076_v31 = vsel %vm626_vm0, %v1073_v61, %v1075_v41  ;;  %v1117_v22 = vmul.f32 %v2162_v60, %v2162_v60  ;;  %v1123_v24 = vsel %vm626_vm0, %v1121_v51, %v1122_v18 }
 0x14a   : > { %v989_v37 = vadd.f32 %v988_v49, %v987_v45  ;;  %v1024_v33 = vrot.slane %v1023_v59, 2  ;;  %v1063_v55 = vadd.f32 %v1062_v32, %v1061_v58  ;;  %v1109_v4 = vadd.f32 %v1108_v40, %v1076_v31 }
 0x14b   : > { %776 = vst [vmem:[%s2257_s4 + $0x1] sm:$0x1] %v775_v48  ;;  %v1124_v47 = vrot.slane %v1117_v22, 1  ;;  %v1157_v12 = vadd.f32 %v1156_v13, %v1123_v24 }
 0x14c   : > { %990 = vst [vmem:[%s2257_s4 + $0x5] sm:$0x1] %v989_v37  ;;  %v1025_v36 = vadd.f32 %v1024_v33, %v1023_v59  ;;  %v1064_v9 = vrot.slane %v1063_v55, 2  ;;  %v1110_v63 = vrot.slane %v1109_v4, 4 }
 0x14d   : > { %v1125_v39 = vsel %vm626_vm0, %v1122_v18, %v1124_v47 }
 0x14e   : > { %v1026_v8 = vrot.slane %v1025_v36, 1  ;;  %v1065_v28 = vadd.f32 %v1064_v9, %v1063_v55  ;;  %v1111_v60 = vadd.f32 %v1110_v63, %v1109_v4  ;;  %v1158_v0 = vadd.f32 %v1157_v12, %v1125_v39 }
 0x150   : > { %v1027_v50 = vadd.f32 %v1026_v8, %v1025_v36  ;;  %v1066_v3 = vrot.slane %v1065_v28, 1  ;;  %v1112_v46 = vrot.slane %v1111_v60, 2  ;;  %v1159_v57 = vrot.slane %v1158_v0, 4 }
 0x152   : > { %1028 = vst [vmem:[%s2257_s4 + $0x2] sm:$0x1] %v1027_v50  ;;  %v1067_v7 = vadd.f32 %v1066_v3, %v1065_v28  ;;  %v1113_v11 = vadd.f32 %v1112_v46, %v1111_v60  ;;  %v1160_v14 = vadd.f32 %v1159_v57, %v1158_v0 }
 0x154   : > { %1068 = vst [vmem:[%s2257_s4 + $0x6] sm:$0x1] %v1067_v7  ;;  %v1114_v53 = vrot.slane %v1113_v11, 1  ;;  %v1161_v19 = vrot.slane %v1160_v14, 2 }
 0x156   : > { %v1115_v27 = vadd.f32 %v1114_v53, %v1113_v11  ;;  %v1162_v16 = vadd.f32 %v1161_v19, %v1160_v14 }
 0x158   : > { %1116 = vst [vmem:[%s2257_s4 + $0x3] sm:$0x1] %v1115_v27  ;;  %v1163_v29 = vrot.slane %v1162_v16, 1 }
 0x15a   : > { %v1164_v54 = vadd.f32 %v1163_v29, %v1162_v16 }
 0x15c   : > { %1165 = vst [vmem:[%s2257_s4 + $0x7] sm:$0x1] %v1164_v54 }
 0x15d PF: > { %s14_s12 = sadd.s32 1, %s1325_s12  }
 0x15e   : > { %p11_p4 = scmp.ge.s32.totalorder %s14_s12, 4  }
 0x160   :  { %13 = sbr.rel (!%p11_p4) target bundleno = 1 (0x1), region = 70 }

</bundles_post_ra>
